<compile_context>
chip_gen: v5e
topology: v5e:2x2
jax: 0.10.0
libtpu: 0.0.40
codegen_flags: <defaults>
</compile_context>

<pallas_src>
import math

import jax
import jax.numpy as jnp
from jax.experimental import pallas as pl
from jax.experimental.pallas import tpu as pltpu


def _round_up(x, m):
    return ((x + m - 1) // m) * m


def clip_proj_kernel(
    text_h_ref,   # [TILE_N, TEXT_DIM]   bf16
    w_text_ref,   # [TEXT_DIM, P_PAD]    bf16 (resident)
    gnn_e_ref,    # [TILE_N, GNN_DIM]    bf16
    w1_ref,       # [GNN_DIM, P_PAD]     bf16 (resident)
    b1_ref,       # [1, P_PAD]           f32  (resident)
    w2_ref,       # [P_PAD, P_PAD]       bf16 (resident, = W2 @ Wproj fused)
    b2_ref,       # [1, P_PAD]           f32  (resident, = b2 @ Wproj fused)
    text_out_ref, # [TILE_N, P_PAD]      f32
    gnn_out_ref,  # [TILE_N, P_PAD]      f32
):
    # ---- text branch: projection (no bias) + L2 normalize over last dim ----
    t = jnp.dot(text_h_ref[...], w_text_ref[...],
                preferred_element_type=jnp.float32)
    t_inv = jax.lax.rsqrt(
        jnp.maximum(jnp.sum(t * t, axis=-1, keepdims=True), 1e-12))
    text_out_ref[...] = (t * t_inv).astype(text_out_ref.dtype)

    # ---- gnn branch: Linear -> ReLU -> fused (Linear @ Linear) -> L2 ----
    h1 = jnp.dot(gnn_e_ref[...], w1_ref[...],
                 preferred_element_type=jnp.float32) + b1_ref[...]
    h1 = jnp.maximum(h1, 0.0)
    g = jnp.dot(h1.astype(w2_ref.dtype), w2_ref[...],
                preferred_element_type=jnp.float32) + b2_ref[...]
    g_inv = jax.lax.rsqrt(
        jnp.maximum(jnp.sum(g * g, axis=-1, keepdims=True), 1e-12))
    gnn_out_ref[...] = (g * g_inv).astype(gnn_out_ref.dtype)


def protein_clip_forward(text_hidden, gnn_embs, params, *, tile_n=512):
    """text_hidden: [B, S, TEXT_DIM]; gnn_embs: [B, S, GNN_DIM] (f32).

    Returns (gnn_embeds, text_embeds, logit_scale) matching ProteinCLIP.forward
    with self_supervised=True, use_text_proj=True.
    """
    B, S, text_dim = text_hidden.shape
    _, _, gnn_dim = gnn_embs.shape
    proj = params["w_text_proj"].shape[1]
    p_pad = _round_up(proj, 128)          # 320 -> 384, lane-dense outputs

    n = B * S
    if n < tile_n:
        tile_n = _round_up(n, 8)
    n_pad = _round_up(n, tile_n)          # ragged tail handled by zero-padding
    num_tiles = n_pad // tile_n

    def pad_to(a, shape):
        return jnp.pad(a, [(0, s - d) for s, d in zip(shape, a.shape)])

    # Token-major 2D slabs; bf16 operands for the MXU.
    text_2d = pad_to(text_hidden.reshape(n, text_dim),
                     (n_pad, text_dim)).astype(jnp.bfloat16)
    gnn_2d = pad_to(gnn_embs.reshape(n, gnn_dim),
                    (n_pad, gnn_dim)).astype(jnp.bfloat16)

    # Fuse gnn_postprocess[2] with gnn_projection (no nonlinearity between):
    #   (h1 @ W2 + b2) @ Wp == h1 @ (W2 @ Wp) + b2 @ Wp
    w2f = params["w_gnn_post2"] @ params["w_gnn_proj"]
    b2f = params["b_gnn_post2"] @ params["w_gnn_proj"]

    # Zero-pad projection columns to p_pad (exact: zero cols -> zero outputs
    # -> no contribution to the L2 norm of kept lanes).
    w_text = pad_to(params["w_text_proj"], (text_dim, p_pad)).astype(jnp.bfloat16)
    w1 = pad_to(params["w_gnn_post1"], (gnn_dim, p_pad)).astype(jnp.bfloat16)
    b1 = pad_to(params["b_gnn_post1"], (1, p_pad)).astype(jnp.float32)
    w2f = pad_to(w2f, (p_pad, p_pad)).astype(jnp.bfloat16)
    b2f = pad_to(b2f, (1, p_pad)).astype(jnp.float32)

    def row_spec(d):
        return pl.BlockSpec((tile_n, d), lambda i: (i, 0))

    def wgt_spec(r, c):
        return pl.BlockSpec((r, c), lambda i: (0, 0))   # VMEM-resident weight

    flops = 2 * n_pad * (text_dim * p_pad + gnn_dim * p_pad + p_pad * p_pad)
    bytes_accessed = (text_2d.size * 2 + gnn_2d.size * 2
                      + w_text.size * 2 + w1.size * 2 + w2f.size * 2
                      + (b1.size + b2f.size) * 4
                      + 2 * n_pad * p_pad * 4)

    text_out, gnn_out = pl.pallas_call(
        clip_proj_kernel,
        out_shape=(
            jax.ShapeDtypeStruct((n_pad, p_pad), jnp.float32),
            jax.ShapeDtypeStruct((n_pad, p_pad), jnp.float32),
        ),
        grid=(num_tiles,),
        in_specs=[
            row_spec(text_dim),          # text hidden tile
            wgt_spec(text_dim, p_pad),   # W_text_proj
            row_spec(gnn_dim),           # gnn emb tile
            wgt_spec(gnn_dim, p_pad),    # W1
            wgt_spec(1, p_pad),          # b1
            wgt_spec(p_pad, p_pad),      # W2 @ Wproj (fused)
            wgt_spec(1, p_pad),          # b2 @ Wproj (fused)
        ],
        out_specs=(
            row_spec(p_pad),
            row_spec(p_pad),
        ),
        compiler_params=pltpu.CompilerParams(
            dimension_semantics=("parallel",),   # v7x: shard tokens over 2 TCs
            vmem_limit_bytes=32 << 20,
        ),
        cost_estimate=pl.CostEstimate(
            flops=flops, transcendentals=0, bytes_accessed=bytes_accessed),
    )(text_2d, w_text, gnn_2d, w1, b1, w2f, b2f)

    logit_scale = jnp.exp(params["logit_scale"])
    gnn_out = gnn_out[:n, :proj].reshape(B, S, proj)
    text_out = text_out[:n, :proj].reshape(B, S, proj)
    return gnn_out, text_out, logit_scale


def init_params(key, text_dim, gnn_dim, proj):
    """Deterministic synthetic weights with PyTorch-Linear-like scaling.

    Stored transposed ([in, out]) so the kernel does x @ W directly.
    """
    ks = jax.random.split(key, 5)

    def lin(k, fan_in, fan_out):
        bound = 1.0 / math.sqrt(fan_in)
        return jax.random.uniform(k, (fan_in, fan_out), jnp.float32,
                                  -bound, bound)

    return {
        "w_text_proj": lin(ks[0], text_dim, proj),   # text_projection (no bias)
        "w_gnn_post1": lin(ks[1], gnn_dim, proj),    # gnn_postprocess[0]
        "b_gnn_post1": jnp.zeros((1, proj), jnp.float32),
        "w_gnn_post2": lin(ks[2], proj, proj),       # gnn_postprocess[2]
        "b_gnn_post2": jnp.zeros((1, proj), jnp.float32),
        "w_gnn_proj": lin(ks[3], proj, proj),        # gnn_projection (no bias)
        "logit_scale": jnp.float32(2.6592),
    }


def reference_forward(text_hidden, gnn_embs, params):
    """Pure-JAX f32 reference of the ProteinCLIP head."""
    t = jnp.einsum("bsd,dp->bsp", text_hidden, params["w_text_proj"])
    t = t / jnp.linalg.norm(t, axis=-1, keepdims=True)
    h = (jnp.einsum("bsd,dp->bsp", gnn_embs, params["w_gnn_post1"])
         + params["b_gnn_post1"][0])
    h = jnp.maximum(h, 0.0)
    h = (jnp.einsum("bsp,pq->bsq", h, params["w_gnn_post2"])
         + params["b_gnn_post2"][0])
    g = jnp.einsum("bsp,pq->bsq", h, params["w_gnn_proj"])
    g = g / jnp.linalg.norm(g, axis=-1, keepdims=True)
    return g, t, jnp.exp(params["logit_scale"])


if __name__ == "__main__":
    B, S = 2, 8
    TEXT_DIM = 640      # ESM-150M hidden size (hard-coded in module)
    GNN_DIM = 64        # terminator_hparams['energies_hidden_dim']
    PROJ = 320          # projection_dim default

    key = jax.random.PRNGKey(0)
    k_text, k_gnn, k_params = jax.random.split(key, 3)

    text_hidden = jax.random.normal(k_text, (B, S, TEXT_DIM), jnp.float32)
    gnn_embs = jax.random.normal(k_gnn, (B, S, GNN_DIM), jnp.float32)
    params = init_params(k_params, TEXT_DIM, GNN_DIM, PROJ)

    gnn_out, text_out, logit_scale = jax.block_until_ready(
        protein_clip_forward(text_hidden, gnn_embs, params)
    )

    g_ref, t_ref, ls_ref = reference_forward(text_hidden, gnn_embs, params)
    # bf16 MXU operands (f32 accumulate / normalize) -> ~1e-3 abs deviation
    # on unit-norm outputs; compare at a bf16-appropriate tolerance.
    assert jnp.allclose(gnn_out, g_ref, atol=1e-2, rtol=1e-2)
    assert jnp.allclose(text_out, t_ref, atol=1e-2, rtol=1e-2)
    assert jnp.allclose(logit_scale, ls_ref)
    assert gnn_out.shape == (B, S, PROJ) and text_out.shape == (B, S, PROJ)

    print("KERNEL_OK")
</pallas_src>

<mosaic_0001>
module attributes {stable_mosaic.version = 11 : i64} {
  func.func @clip_proj_kernel(%arg0: i32, %arg1: memref<16x640xbf16, #tpu.memory_space<vmem>>, %arg2: memref<640x384xbf16, #tpu.memory_space<vmem>>, %arg3: memref<16x64xbf16, #tpu.memory_space<vmem>>, %arg4: memref<64x384xbf16, #tpu.memory_space<vmem>>, %arg5: memref<1x384xf32, #tpu.memory_space<vmem>>, %arg6: memref<384x384xbf16, #tpu.memory_space<vmem>>, %arg7: memref<1x384xf32, #tpu.memory_space<vmem>>, %arg8: memref<16x384xf32, #tpu.memory_space<vmem>>, %arg9: memref<16x384xf32, #tpu.memory_space<vmem>>) attributes {dimension_semantics = [#tpu.dimension_semantics<parallel>], iteration_bounds = array<i64: 1>, scalar_prefetch = 0 : i64, scratch_operands = 0 : i64, tpu.core_type = #tpu.core_type<tc>, window_params = [{transform_indices = @transform_0, window_bounds = array<i64: 16, 640>}, {pipeline_mode = #tpu.pipeline_mode<synchronous>, transform_indices = @transform_1, window_bounds = array<i64: 640, 384>}, {transform_indices = @transform_2, window_bounds = array<i64: 16, 64>}, {pipeline_mode = #tpu.pipeline_mode<synchronous>, transform_indices = @transform_3, window_bounds = array<i64: 64, 384>}, {pipeline_mode = #tpu.pipeline_mode<synchronous>, transform_indices = @transform_4, window_bounds = array<i64: 1, 384>}, {pipeline_mode = #tpu.pipeline_mode<synchronous>, transform_indices = @transform_5, window_bounds = array<i64: 384, 384>}, {pipeline_mode = #tpu.pipeline_mode<synchronous>, transform_indices = @transform_6, window_bounds = array<i64: 1, 384>}, {transform_indices = @transform_7, window_bounds = array<i64: 16, 384>}, {transform_indices = @transform_8, window_bounds = array<i64: 16, 384>}]} {
    %c0 = arith.constant 0 : index
    %c0_0 = arith.constant 0 : index
    %0 = vector.load %arg1[%c0, %c0_0] : memref<16x640xbf16, #tpu.memory_space<vmem>>, vector<16x640xbf16>
    %c0_1 = arith.constant 0 : index
    %c0_2 = arith.constant 0 : index
    %1 = vector.load %arg2[%c0_1, %c0_2] : memref<640x384xbf16, #tpu.memory_space<vmem>>, vector<640x384xbf16>
    %cst = arith.constant dense<0.000000e+00> : vector<16x384xf32>
    %2 = tpu.matmul %0, %1, %cst {dimension_numbers = #tpu.dot_dimension_numbers<[1], [0], [0], [1], [0, 0, 1, 1], [], []>} : vector<16x640xbf16>, vector<640x384xbf16>, vector<16x384xf32> -> vector<16x384xf32>
    %3 = arith.mulf %2, %2 : vector<16x384xf32>
    %cst_3 = arith.constant dense<0.000000e+00> : vector<16xf32>
    %4 = vector.multi_reduction <add>, %3, %cst_3 [1] : vector<16x384xf32> to vector<16xf32>
    %5 = vector.shape_cast %4 : vector<16xf32> to vector<16x1xf32>
    %cst_4 = arith.constant 9.99999996E-13 : f32
    %6 = vector.broadcast %cst_4 : f32 to vector<16x1xf32>
    %7 = arith.maximumf %5, %6 : vector<16x1xf32>
    %8 = math.rsqrt %7 : vector<16x1xf32>
    %9 = vector.broadcast %8 : vector<16x1xf32> to vector<16x384xf32>
    %10 = arith.mulf %2, %9 : vector<16x384xf32>
    %c0_5 = arith.constant 0 : index
    %c0_6 = arith.constant 0 : index
    %11 = vector.load %arg8[%c0_5, %c0_6] : memref<16x384xf32, #tpu.memory_space<vmem>>, vector<16x384xf32>
    tpu.vector_store %arg8[%c0_5, %c0_6], %10 {strides = array<i32>} : memref<16x384xf32, #tpu.memory_space<vmem>>, vector<16x384xf32>,
    %c0_7 = arith.constant 0 : index
    %c0_8 = arith.constant 0 : index
    %12 = vector.load %arg3[%c0_7, %c0_8] : memref<16x64xbf16, #tpu.memory_space<vmem>>, vector<16x64xbf16>
    %c0_9 = arith.constant 0 : index
    %c0_10 = arith.constant 0 : index
    %13 = vector.load %arg4[%c0_9, %c0_10] : memref<64x384xbf16, #tpu.memory_space<vmem>>, vector<64x384xbf16>
    %cst_11 = arith.constant dense<0.000000e+00> : vector<16x384xf32>
    %14 = tpu.matmul %12, %13, %cst_11 {dimension_numbers = #tpu.dot_dimension_numbers<[1], [0], [0], [1], [0, 0, 1, 1], [], []>} : vector<16x64xbf16>, vector<64x384xbf16>, vector<16x384xf32> -> vector<16x384xf32>
    %c0_12 = arith.constant 0 : index
    %c0_13 = arith.constant 0 : index
    %15 = vector.load %arg5[%c0_12, %c0_13] : memref<1x384xf32, #tpu.memory_space<vmem>>, vector<1x384xf32>
    %16 = vector.broadcast %15 : vector<1x384xf32> to vector<16x384xf32>
    %17 = arith.addf %14, %16 : vector<16x384xf32>
    %cst_14 = arith.constant 0.000000e+00 : f32
    %18 = vector.broadcast %cst_14 : f32 to vector<16x384xf32>
    %19 = arith.maximumf %17, %18 : vector<16x384xf32>
    %20 = arith.truncf %19 : vector<16x384xf32> to vector<16x384xbf16>
    %c0_15 = arith.constant 0 : index
    %c0_16 = arith.constant 0 : index
    %21 = vector.load %arg6[%c0_15, %c0_16] : memref<384x384xbf16, #tpu.memory_space<vmem>>, vector<384x384xbf16>
    %cst_17 = arith.constant dense<0.000000e+00> : vector<16x384xf32>
    %22 = tpu.matmul %20, %21, %cst_17 {dimension_numbers = #tpu.dot_dimension_numbers<[1], [0], [0], [1], [0, 0, 1, 1], [], []>} : vector<16x384xbf16>, vector<384x384xbf16>, vector<16x384xf32> -> vector<16x384xf32>
    %c0_18 = arith.constant 0 : index
    %c0_19 = arith.constant 0 : index
    %23 = vector.load %arg7[%c0_18, %c0_19] : memref<1x384xf32, #tpu.memory_space<vmem>>, vector<1x384xf32>
    %24 = vector.broadcast %23 : vector<1x384xf32> to vector<16x384xf32>
    %25 = arith.addf %22, %24 : vector<16x384xf32>
    %26 = arith.mulf %25, %25 : vector<16x384xf32>
    %cst_20 = arith.constant dense<0.000000e+00> : vector<16xf32>
    %27 = vector.multi_reduction <add>, %26, %cst_20 [1] : vector<16x384xf32> to vector<16xf32>
    %28 = vector.shape_cast %27 : vector<16xf32> to vector<16x1xf32>
    %cst_21 = arith.constant 9.99999996E-13 : f32
    %29 = vector.broadcast %cst_21 : f32 to vector<16x1xf32>
    %30 = arith.maximumf %28, %29 : vector<16x1xf32>
    %31 = math.rsqrt %30 : vector<16x1xf32>
    %32 = vector.broadcast %31 : vector<16x1xf32> to vector<16x384xf32>
    %33 = arith.mulf %25, %32 : vector<16x384xf32>
    %c0_22 = arith.constant 0 : index
    %c0_23 = arith.constant 0 : index
    %34 = vector.load %arg9[%c0_22, %c0_23] : memref<16x384xf32, #tpu.memory_space<vmem>>, vector<16x384xf32>
    tpu.vector_store %arg9[%c0_22, %c0_23], %33 {strides = array<i32>} : memref<16x384xf32, #tpu.memory_space<vmem>>, vector<16x384xf32>,
    return
  }
  func.func @transform_0(%arg0: i32) -> (i32, i32) {
    %c0_i32 = arith.constant 0 : i32
    %c0_i32_0 = arith.constant 0 : i32
    return %arg0, %c0_i32 : i32, i32
  }
  func.func @transform_1(%arg0: i32) -> (i32, i32) {
    %c0_i32 = arith.constant 0 : i32
    %c0_i32_0 = arith.constant 0 : i32
    %c0_i32_1 = arith.constant 0 : i32
    return %c0_i32, %c0_i32_0 : i32, i32
  }
  func.func @transform_2(%arg0: i32) -> (i32, i32) {
    %c0_i32 = arith.constant 0 : i32
    %c0_i32_0 = arith.constant 0 : i32
    return %arg0, %c0_i32 : i32, i32
  }
  func.func @transform_3(%arg0: i32) -> (i32, i32) {
    %c0_i32 = arith.constant 0 : i32
    %c0_i32_0 = arith.constant 0 : i32
    %c0_i32_1 = arith.constant 0 : i32
    return %c0_i32, %c0_i32_0 : i32, i32
  }
  func.func @transform_4(%arg0: i32) -> (i32, i32) {
    %c0_i32 = arith.constant 0 : i32
    %c0_i32_0 = arith.constant 0 : i32
    %c0_i32_1 = arith.constant 0 : i32
    return %c0_i32, %c0_i32_0 : i32, i32
  }
  func.func @transform_5(%arg0: i32) -> (i32, i32) {
    %c0_i32 = arith.constant 0 : i32
    %c0_i32_0 = arith.constant 0 : i32
    %c0_i32_1 = arith.constant 0 : i32
    return %c0_i32, %c0_i32_0 : i32, i32
  }
  func.func @transform_6(%arg0: i32) -> (i32, i32) {
    %c0_i32 = arith.constant 0 : i32
    %c0_i32_0 = arith.constant 0 : i32
    %c0_i32_1 = arith.constant 0 : i32
    return %c0_i32, %c0_i32_0 : i32, i32
  }
  func.func @transform_7(%arg0: i32) -> (i32, i32) {
    %c0_i32 = arith.constant 0 : i32
    %c0_i32_0 = arith.constant 0 : i32
    return %arg0, %c0_i32 : i32, i32
  }
  func.func @transform_8(%arg0: i32) -> (i32, i32) {
    %c0_i32 = arith.constant 0 : i32
    %c0_i32_0 = arith.constant 0 : i32
    return %arg0, %c0_i32 : i32, i32
  }
}

</mosaic_0001>

<bundles_post_ra>
// kernel: tpu_custom_call.1
= control target key start
LH: loop header
LB: loop body
LE: loop exit
PB: predicated region body
PF: predicated region fallthrough
CT: control target
= control target key end

     0   :  { %14 = vsyncpa [#allocation3], 0  ;;  %s3579_s0 = inlined_call_operand.hbm [shape: bf16[16,640], index: 0, kind: input, shape index: {}]   ;;  %s3580_s1 = inlined_call_operand.hbm [shape: bf16[640,384], index: 1, kind: input, shape index: {}]   ;;  %s3581_s2 = inlined_call_operand.hbm [shape: bf16[16,64], index: 2, kind: input, shape index: {}]   ;;  %s3582_s3 = inlined_call_operand.hbm [shape: bf16[64,384], index: 3, kind: input, shape index: {}]   ;;  %s3583_s4 = inlined_call_operand.vmem [shape: f32[1,384], index: 4, kind: input, shape index: {}]   ;;  %s3584_s5 = inlined_call_operand.hbm [shape: bf16[384,384], index: 5, kind: input, shape index: {}]   ;;  %s3585_s6 = inlined_call_operand.hbm [shape: f32[1,384], index: 6, kind: input, shape index: {}]   ;;  %s3586_s7 = inlined_call_operand.hbm [shape: f32[16,384], index: 7, kind: output, shape index: {0}]   ;;  %s3587_s8 = inlined_call_operand.hbm [shape: f32[16,384], index: 8, kind: output, shape index: {1}]  }
   0x1   :  { %15 = vsyncpa [#allocation6], 0 }
   0x2   :  { %16 = vsyncpa [#allocation9], 0 }
   0x3   :  { %17 = vsyncpa [#allocation12], 0 }
   0x4   :  { %18 = vsyncpa [#allocation4], 0  ;;  %s37_s29 = sshll.u32 %s3580_s1, 4  ;;  %s38_s29 = int_to_ptr.hbm [resolvable:$true] %s37_s29 }
   0x5   :  { %19 = vsyncpa [#allocation15], 0  ;;  %s3346_s30 = smov [#allocation5]   ;;  %s63_s12 = sshll.u32 %s3582_s3, 4  ;;  %s64_s12 = int_to_ptr.hbm [resolvable:$true] %s63_s12 }
   0x6   :  { %s39_s9 = sshll.u32 %s3346_s30, 4  ;;  %s3347_s13 = smov 192   ;;  %s40_s9 = int_to_ptr.vmem [resolvable:$true] %s39_s9 }
   0x7   :  { %s3348_s14 = smov 12   ;;  %s3349_s15 = smov [#allocation8]  }
   0x8   :  { %45 = dma.hbm_to_vmem [thread:$0]  %s38_s29, 15360, %s40_s9, [#allocation6], %s3347_s13, %s3347_s13, %s3348_s14  }
   0x9   :  { %s65_s16 = sshll.u32 %s3349_s15, 4  ;;  %s24_s18 = sshll.u32 %s3579_s0, 4  ;;  %s66_s16 = int_to_ptr.vmem [resolvable:$true] %s65_s16  ;;  %s25_s18 = int_to_ptr.hbm [resolvable:$true] %s24_s18 }
   0xa   :  { %71 = dma.hbm_to_vmem [thread:$0]  %s64_s12, 1536, %s66_s16, [#allocation9], %s3347_s13, %s3347_s13, %s3348_s14  }
   0xb   :  { %s3350_s3 = smov [#allocation2]   ;;  %s50_s22 = sshll.u32 %s3581_s2, 4  ;;  %s51_s22 = int_to_ptr.hbm [resolvable:$true] %s50_s22 }
   0xc   :  { %s26_s19 = sshll.u32 %s3350_s3, 4  ;;  %s3351_s23 = smov 320   ;;  %s27_s19 = int_to_ptr.vmem [resolvable:$true] %s26_s19 }
   0xd   :  { %s3352_s24 = smov 20   ;;  %s3353_s25 = smov [#allocation7]  }
   0xe   :  { %32 = dma.hbm_to_vmem [thread:$0]  %s25_s18, 640, %s27_s19, [#allocation3], %s3351_s23, %s3351_s23, %s3352_s24  }
   0xf   :  { %s52_s26 = sshll.u32 %s3353_s25, 4  ;;  %s3354_s0 = smov 64   ;;  %s53_s26 = int_to_ptr.vmem [resolvable:$true] %s52_s26 }
  0x10   :  { %s3355_s27 = smov 4   ;;  %s78_s30 = sshll.u32 %s3584_s5, 4  ;;  %s79_s30 = int_to_ptr.hbm [resolvable:$true] %s78_s30 }
  0x11   :  { %58 = dma.hbm_to_vmem [thread:$0]  %s51_s22, 128, %s53_s26, [#allocation6], %s3354_s0, %s3354_s0, %s3355_s27  }
  0x12   :  { %s3356_s9 = smov [#allocation10]   ;;  %s92_s12 = sshll.u32 %s3585_s6, 4  ;;  %s93_s12 = int_to_ptr.hbm [resolvable:$true] %s92_s12 }
  0x13   :  { %s80_s10 = sshll.u32 %s3356_s9, 4  ;;  %s3357_s15 = smov [#allocation11]   ;;  %s81_s10 = int_to_ptr.vmem [resolvable:$true] %s80_s10 }
  0x14   :  { %86 = dma.hbm_to_vmem [thread:$0]  %s79_s30, 9216, %s81_s10, [#allocation9], %s3347_s13, %s3347_s13, %s3348_s14  }
  0x15   :  { %s94_s16 = sshll.u32 %s3357_s15, 4  ;;  %s95_s16 = int_to_ptr.vmem [resolvable:$true] %s94_s16 }
  0x16   :  { %97 = dma.hbm_to_vmem [thread:$0]  %s93_s12, 48, %s95_s16, [#allocation12]  }
  0x17   :  { %3334 = dma.done.wait [#allocation3], 640  }
  0x18   :  { %3335 = vsyncadd [#allocation3], 4294966656 }
  0x19   :  { %3336 = dma.done.wait [#allocation6], 15488  }
  0x1a   :  { %3337 = vsyncadd [#allocation6], 4294951808 }
  0x1b   :  { %3338 = dma.done.wait [#allocation9], 10752  }
  0x1c   :  { %3339 = vsyncadd [#allocation9], 4294956544 }
  0x1d   :  { %3340 = dma.done.wait [#allocation12], 48  }
  0x1e   :  { %3341 = vsyncadd [#allocation12], 4294967248  ;;  %v2171_v0 = vld [vmem:[#allocation5 + $0xa8] sm:$0xf]  ;;  %v2935_v1 = vld [vmem:[#allocation5 + $0xb0] sm:$0xf0] }
  0x1f   :  { %v2363_v2 = vld [vmem:[#allocation5 + $0x228] sm:$0xf]  ;;  %v2172_v3 = vor.u32 %v2935_v1, %v2171_v0  ;;  %v2983_v4 = vld [vmem:[#allocation5 + $0x230] sm:$0xf0]  ;;  %v2159_v11 = vld [vmem:[#allocation5 + $0x90] sm:$0xf] }
  0x20   :  { %v2459_v5 = vld [vmem:[#allocation5 + $0x2e8] sm:$0xf]  ;;  %v3007_v6 = vld [vmem:[#allocation5 + $0x2f0] sm:$0xf0]  ;;  %v2364_v7 = vor.u32 %v2983_v4, %v2363_v2  ;;  %v2932_v13 = vld [vmem:[#allocation5 + $0x98] sm:$0xf0] }
  0x21   :  { %v2460_v8 = vor.u32 %v3007_v6, %v2459_v5  ;;  %v2267_v9 = vld [vmem:[#allocation5 + $0x168] sm:$0xf]  ;;  %v2959_v10 = vld [vmem:[#allocation5 + $0x170] sm:$0xf0]  ;;  %955 = vmatpush.bf16.msra.mxu0 %v2172_v3  ;;  %v2351_v14 = vld [vmem:[#allocation5 + $0x210] sm:$0xf]  ;;  %v2160_v16 = vor.u32 %v2932_v13, %v2159_v11 }
  0x22   :  { %v2268_v12 = vor.u32 %v2959_v10, %v2267_v9  ;;  %v2980_v15 = vld [vmem:[#allocation5 + $0x218] sm:$0xf0]  ;;  %983 = vmatpush.bf16.msra.mxu2 %v2364_v7  ;;  %v2447_v18 = vld [vmem:[#allocation5 + $0x2d0] sm:$0xf]  ;;  %v2147_v23 = vld [vmem:[#allocation5 + $0x78] sm:$0xf] }
  0x23   :  { %997 = vmatpush.bf16.msra.mxu3 %v2460_v8  ;;  %v2352_v17 = vor.u32 %v2980_v15, %v2351_v14  ;;  %v3004_v19 = vld [vmem:[#allocation5 + $0x2d8] sm:$0xf0]  ;;  %v2255_v20 = vld [vmem:[#allocation5 + $0x150] sm:$0xf]  ;;  %v2929_v24 = vld [vmem:[#allocation5 + $0x80] sm:$0xf0] }
  0x24   :  { %969 = vmatpush.bf16.msra.mxu1 %v2268_v12  ;;  %v2448_v21 = vor.u32 %v3004_v19, %v2447_v18  ;;  %v2956_v22 = vld [vmem:[#allocation5 + $0x158] sm:$0xf0]  ;;  %v2339_v26 = vld [vmem:[#allocation5 + $0x1f8] sm:$0xf]  ;;  %v2977_v27 = vld [vmem:[#allocation5 + $0x200] sm:$0xf0]  ;;  %v2148_v29 = vor.u32 %v2929_v24, %v2147_v23 }
  0x25   :  { %v2256_v25 = vor.u32 %v2956_v22, %v2255_v20  ;;  %v2435_v28 = vld [vmem:[#allocation5 + $0x2b8] sm:$0xf]  ;;  %956 = vmatpush.bf16.msra.mxu0 %v2160_v16  ;;  %v3001_v30 = vld [vmem:[#allocation5 + $0x2c0] sm:$0xf0]  ;;  %v2340_v33 = vor.u32 %v2977_v27, %v2339_v26  ;;  %v2135_v35 = vld [vmem:[#allocation5 + $0x60] sm:$0xf] }
  0x26   :  { %v2243_v31 = vld [vmem:[#allocation5 + $0x138] sm:$0xf]  ;;  %v2953_v32 = vld [vmem:[#allocation5 + $0x140] sm:$0xf0]  ;;  %984 = vmatpush.bf16.msra.mxu2 %v2352_v17  ;;  %v2436_v34 = vor.u32 %v3001_v30, %v2435_v28  ;;  %v2926_v36 = vld [vmem:[#allocation5 + $0x68] sm:$0xf0] }
  0x27   :  { %998 = vmatpush.bf16.msra.mxu3 %v2448_v21  ;;  %v2327_v37 = vld [vmem:[#allocation5 + $0x1e0] sm:$0xf]  ;;  %v2244_v38 = vor.u32 %v2953_v32, %v2243_v31  ;;  %v2974_v39 = vld [vmem:[#allocation5 + $0x1e8] sm:$0xf0]  ;;  %v2136_v44 = vor.u32 %v2926_v36, %v2135_v35  ;;  %v2123_v47 = vld [vmem:[#allocation5 + $0x48] sm:$0xf] }
  0x28   :  { %970 = vmatpush.bf16.msra.mxu1 %v2256_v25  ;;  %v2423_v40 = vld [vmem:[#allocation5 + $0x2a0] sm:$0xf]  ;;  %v2998_v41 = vld [vmem:[#allocation5 + $0x2a8] sm:$0xf0]  ;;  %v2328_v45 = vor.u32 %v2974_v39, %v2327_v37  ;;  %v2923_v48 = vld [vmem:[#allocation5 + $0x50] sm:$0xf0] }
  0x29   :  { %v2231_v42 = vld [vmem:[#allocation5 + $0x120] sm:$0xf]  ;;  %v2950_v43 = vld [vmem:[#allocation5 + $0x128] sm:$0xf0]  ;;  %957 = vmatpush.bf16.msra.mxu0 %v2148_v29  ;;  %v2424_v46 = vor.u32 %v2998_v41, %v2423_v40  ;;  %v2315_v49 = vld [vmem:[#allocation5 + $0x1c8] sm:$0xf]  ;;  %v2124_v56 = vor.u32 %v2923_v48, %v2123_v47 }
  0x2a   :  { %985 = vmatpush.bf16.msra.mxu2 %v2340_v33  ;;  %v2232_v50 = vor.u32 %v2950_v43, %v2231_v42  ;;  %v2971_v51 = vld [vmem:[#allocation5 + $0x1d0] sm:$0xf0]  ;;  %v2411_v52 = vld [vmem:[#allocation5 + $0x288] sm:$0xf]  ;;  %v2111_v59 = vld [vmem:[#allocation5 + $0x30] sm:$0xf] }
  0x2b   :  { %999 = vmatpush.bf16.msra.mxu3 %v2436_v34  ;;  %v2995_v53 = vld [vmem:[#allocation5 + $0x290] sm:$0xf0]  ;;  %v2219_v54 = vld [vmem:[#allocation5 + $0x108] sm:$0xf]  ;;  %v2316_v57 = vor.u32 %v2971_v51, %v2315_v49  ;;  %v2920_v60 = vld [vmem:[#allocation5 + $0x38] sm:$0xf0] }
  0x2c   :  { %971 = vmatpush.bf16.msra.mxu1 %v2244_v38  ;;  %v2947_v55 = vld [vmem:[#allocation5 + $0x110] sm:$0xf0]  ;;  %v2412_v58 = vor.u32 %v2995_v53, %v2411_v52  ;;  %v2303_v61 = vld [vmem:[#allocation5 + $0x1b0] sm:$0xf]  ;;  %v2968_v63 = vld [vmem:[#allocation5 + $0x1b8] sm:$0xf0]  ;;  %v2112_v4 = vor.u32 %v2920_v60, %v2111_v59 }
  0x2d   :  { %958 = vmatpush.bf16.msra.mxu0 %v2136_v44  ;;  %v2220_v62 = vor.u32 %v2947_v55, %v2219_v54  ;;  %v2399_v0 = vld [vmem:[#allocation5 + $0x270] sm:$0xf]  ;;  %v2992_v1 = vld [vmem:[#allocation5 + $0x278] sm:$0xf0]  ;;  %v2304_v5 = vor.u32 %v2968_v63, %v2303_v61  ;;  %v2099_v7 = vld [vmem:[#allocation5 + $0x18] sm:$0xf] }
  0x2e   :  { %986 = vmatpush.bf16.msra.mxu2 %v2328_v45  ;;  %v2207_v2 = vld [vmem:[#allocation5 + $0xf0] sm:$0xf]  ;;  %v2944_v3 = vld [vmem:[#allocation5 + $0xf8] sm:$0xf0]  ;;  %v2400_v6 = vor.u32 %v2992_v1, %v2399_v0  ;;  %v2917_v8 = vld [vmem:[#allocation5 + $0x20] sm:$0xf0] }
  0x2f   :  { %1000 = vmatpush.bf16.msra.mxu3 %v2424_v46  ;;  %v2291_v9 = vld [vmem:[#allocation5 + $0x198] sm:$0xf]  ;;  %v2208_v10 = vor.u32 %v2944_v3, %v2207_v2  ;;  %v2965_v11 = vld [vmem:[#allocation5 + $0x1a0] sm:$0xf0]  ;;  %v2100_v16 = vor.u32 %v2917_v8, %v2099_v7  ;;  %v2087_v17 = vld [vmem:[#allocation5] sm:$0xf] }
  0x30   :  { %972 = vmatpush.bf16.msra.mxu1 %v2232_v50  ;;  %v2387_v12 = vld [vmem:[#allocation5 + $0x258] sm:$0xf]  ;;  %v2989_v13 = vld [vmem:[#allocation5 + $0x260] sm:$0xf0]  ;;  %v2914_v18 = vld [vmem:[#allocation5 + $0x8] sm:$0xf0]  ;;  %v2292_v19 = vor.u32 %v2965_v11, %v2291_v9 }
  0x31   :  { %959 = vmatpush.bf16.msra.mxu0 %v2124_v56  ;;  %v2195_v14 = vld [vmem:[#allocation5 + $0xd8] sm:$0xf]  ;;  %v2941_v15 = vld [vmem:[#allocation5 + $0xe0] sm:$0xf0]  ;;  %v2388_v20 = vor.u32 %v2989_v13, %v2387_v12  ;;  %v2279_v21 = vld [vmem:[#allocation5 + $0x180] sm:$0xf]  ;;  %v2088_v31 = vor.u32 %v2914_v18, %v2087_v17 }
  0x32   :  { %987 = vmatpush.bf16.msra.mxu2 %v2316_v57  ;;  %v2962_v22 = vld [vmem:[#allocation5 + $0x188] sm:$0xf0]  ;;  %v2375_v23 = vld [vmem:[#allocation5 + $0x240] sm:$0xf]  ;;  %v2196_v24 = vor.u32 %v2941_v15, %v2195_v14  ;;  %v2555_v26 = vld [vmem:[#allocation5 + $0x3a8] sm:$0xf] }
  0x33   :  { %1001 = vmatpush.bf16.msra.mxu3 %v2412_v58  ;;  %v2986_v25 = vld [vmem:[#allocation5 + $0x248] sm:$0xf0]  ;;  %v3031_v27 = vld [vmem:[#allocation5 + $0x3b0] sm:$0xf0]  ;;  %v2269_v29 = vld [vmem:[#allocation5 + $0x174] sm:$0xf0]  ;;  %v2280_v35 = vor.u32 %v2962_v22, %v2279_v21 }
  0x34   :  { %973 = vmatpush.bf16.msra.mxu1 %v2220_v62  ;;  %v2958_v28 = vld [vmem:[#allocation5 + $0x16c] sm:$0xf]  ;;  %v2365_v32 = vld [vmem:[#allocation5 + $0x234] sm:$0xf0]  ;;  %v2183_v33 = vld [vmem:[#allocation5 + $0xc0] sm:$0xf]  ;;  %v2376_v36 = vor.u32 %v2986_v25, %v2375_v23  ;;  %v2556_v39 = vor.u32 %v3031_v27, %v2555_v26 }
  0x35   :  { %960 = vmatpush.bf16.msra.mxu0 %v2112_v4  ;;  %v2982_v30 = vld [vmem:[#allocation5 + $0x22c] sm:$0xf]  ;;  %v2173_v38 = vld [vmem:[#allocation5 + $0xb4] sm:$0xf0]  ;;  %v2272_v40 = vor.u32 %v2958_v28, %v2269_v29  ;;  %v2543_v41 = vld [vmem:[#allocation5 + $0x390] sm:$0xf] }
  0x36   :  { %988 = vmatpush.bf16.msra.mxu2 %v2304_v5  ;;  %v2938_v34 = vld [vmem:[#allocation5 + $0xc8] sm:$0xf0]  ;;  %v2368_v42 = vor.u32 %v2982_v30, %v2365_v32  ;;  %v3028_v44 = vld [vmem:[#allocation5 + $0x398] sm:$0xf0]  ;;  %v2955_v45 = vld [vmem:[#allocation5 + $0x154] sm:$0xf] }
  0x37   :  { %1002 = vmatpush.bf16.msra.mxu3 %v2400_v6  ;;  %v2934_v37 = vld [vmem:[#allocation5 + $0xac] sm:$0xf]  ;;  %v2184_v43 = vor.u32 %v2938_v34, %v2183_v33  ;;  %v2257_v46 = vld [vmem:[#allocation5 + $0x15c] sm:$0xf0]  ;;  %v2979_v48 = vld [vmem:[#allocation5 + $0x214] sm:$0xf]  ;;  %v2544_v54 = vor.u32 %v3028_v44, %v2543_v41 }
  0x38   :  { %974 = vmatpush.bf16.msra.mxu1 %v2208_v10  ;;  %v2176_v47 = vor.u32 %v2934_v37, %v2173_v38  ;;  %v2353_v49 = vld [vmem:[#allocation5 + $0x21c] sm:$0xf0]  ;;  %v2931_v50 = vld [vmem:[#allocation5 + $0x94] sm:$0xf]  ;;  %v2067_v52 = vld [vmem:[#allocation2] sm:$0xf]  ;;  %v2260_v55 = vor.u32 %v2955_v45, %v2257_v46 }
  0x39   :  { %961 = vmatpush.bf16.msra.mxu0 %v2100_v16  ;;  %v2161_v51 = vld [vmem:[#allocation5 + $0x9c] sm:$0xf0]  ;;  %v2910_v53 = vld [vmem:[#allocation2 + $0x10] sm:$0xf0]  ;;  %v2531_v56 = vld [vmem:[#allocation5 + $0x378] sm:$0xf]  ;;  %v2356_v60 = vor.u32 %v2979_v48, %v2353_v49 }
  0x3a   :  { %989 = vmatpush.bf16.msra.mxu2 %v2292_v19  ;;  %v3025_v57 = vld [vmem:[#allocation5 + $0x380] sm:$0xf0]  ;;  %v2952_v58 = vld [vmem:[#allocation5 + $0x13c] sm:$0xf]  ;;  %v3434_v59 = vor.u32 %v2910_v53, %v2067_v52  ;;  %v2245_v61 = vld [vmem:[#allocation5 + $0x144] sm:$0xf0]  ;;  %v2164_v0 = vor.u32 %v2931_v50, %v2161_v51 }
  0x3b   :  { %1003 = vmatpush.bf16.msra.mxu3 %v2388_v20  ;;  %v2976_v62 = vld [vmem:[#allocation5 + $0x1fc] sm:$0xf]  ;;  %v2075_v63 = vld [vmem:[#allocation2 + $0x8] sm:$0xf]  ;;  %v2341_v1 = vld [vmem:[#allocation5 + $0x204] sm:$0xf0]  ;;  %v2532_v8 = vor.u32 %v3025_v57, %v2531_v56  ;;  %v2248_v9 = vor.u32 %v2952_v58, %v2245_v61 }
  0x3c   :  { %975 = vmatpush.bf16.msra.mxu1 %v2196_v24  ;;  %v2928_v2 = vld [vmem:[#allocation5 + $0x7c] sm:$0xf]  ;;  %v2911_v3 = vld [vmem:[#allocation2 + $0x18] sm:$0xf0]  ;;  %v2149_v4 = vld [vmem:[#allocation5 + $0x84] sm:$0xf0]  ;;  %v2344_v13 = vor.u32 %v2976_v62, %v2341_v1 }
  0x3d   :  { %962 = vmatpush.bf16.msra.mxu0 %v2088_v31  ;;  %v3437_v5 = vor.u32 %v2911_v3, %v2075_v63  ;;  %v2909_v6 = vld [vmem:[#allocation2 + $0xc] sm:$0xf]  ;;  %v2077_v7 = vld [vmem:[#allocation2 + $0x1c] sm:$0xf0]  ;;  %v2519_v10 = vld [vmem:[#allocation5 + $0x360] sm:$0xf]  ;;  %v2152_v17 = vor.u32 %v2928_v2, %v2149_v4 }
  0x3e   :  { %990 = vmatpush.bf16.msra.mxu2 %v2280_v35  ;;  %v3022_v11 = vld [vmem:[#allocation5 + $0x368] sm:$0xf0]  ;;  %v3439_v12 = vor.u32 %v2909_v6, %v2077_v7  ;;  %v2949_v14 = vld [vmem:[#allocation5 + $0x124] sm:$0xf]  ;;  %v2233_v15 = vld [vmem:[#allocation5 + $0x12c] sm:$0xf0] }
  0x3f   :  { %1004 = vmatpush.bf16.msra.mxu3 %v2376_v36  ;;  %v2908_v16 = vld [vmem:[#allocation2 + $0x4] sm:$0xf]  ;;  %v2973_v18 = vld [vmem:[#allocation5 + $0x1e4] sm:$0xf]  ;;  %v2329_v19 = vld [vmem:[#allocation5 + $0x1ec] sm:$0xf0]  ;;  %v2520_v24 = vor.u32 %v3022_v11, %v2519_v10  ;;  %v2236_v25 = vor.u32 %v2949_v14, %v2233_v15 }
  0x40   :  { %976 = vmatpush.bf16.msra.mxu1 %v2184_v43  ;;  %963 = vmatmul.bf16.vlgmr.msra.gmra.mxu0 %v3434_v59  ;;  %v2069_v20 = vld [vmem:[#allocation2 + $0x14] sm:$0xf0]  ;;  %v2925_v21 = vld [vmem:[#allocation5 + $0x64] sm:$0xf]  ;;  %v2507_v26 = vld [vmem:[#allocation5 + $0x348] sm:$0xf]  ;;  %v2332_v27 = vor.u32 %v2973_v18, %v2329_v19 }
  0x41   :  { %1011 = vmatpush.bf16.msrb.mxu0 %v2556_v39  ;;  %991 = vmatmul.bf16.vlgmr.msra.gmra.mxu2 %v3437_v5  ;;  %v2137_v22 = vld [vmem:[#allocation5 + $0x6c] sm:$0xf0]  ;;  %v3443_v23 = vor.u32 %v2908_v16, %v2069_v20  ;;  %v3019_v28 = vld [vmem:[#allocation5 + $0x350] sm:$0xf0]  ;;  %v2946_v29 = vld [vmem:[#allocation5 + $0x10c] sm:$0xf] }
  0x42   :  { %1039 = vmatpush.bf16.msrb.mxu2 %v2272_v40  ;;  %1005 = vmatmul.bf16.vlgmr.msra.gmra.mxu3 %v3439_v12  ;;  %v2221_v30 = vld [vmem:[#allocation5 + $0x114] sm:$0xf0]  ;;  %v2140_v31 = vor.u32 %v2925_v21, %v2137_v22  ;;  %v2970_v32 = vld [vmem:[#allocation5 + $0x1cc] sm:$0xf]  ;;  %v2508_v36 = vor.u32 %v3019_v28, %v2507_v26  ;;  %v2495_v38 = vld [vmem:[#allocation5 + $0x330] sm:$0xf] }
  0x43   :  { %1053 = vmatpush.bf16.msrb.mxu3 %v2368_v42  ;;  %977 = vmatmul.bf16.vlgmr.msra.gmra.mxu1 %v3443_v23  ;;  %v2317_v33 = vld [vmem:[#allocation5 + $0x1d4] sm:$0xf0]  ;;  %v2922_v34 = vld [vmem:[#allocation5 + $0x4c] sm:$0xf]  ;;  %v2224_v37 = vor.u32 %v2946_v29, %v2221_v30  ;;  %v3016_v40 = vld [vmem:[#allocation5 + $0x338] sm:$0xf0] }
  0x44   :  { %1025 = vmatpush.bf16.msrb.mxu1 %v2176_v47  ;;  %v2125_v35 = vld [vmem:[#allocation5 + $0x54] sm:$0xf0]  ;;  %v2320_v39 = vor.u32 %v2970_v32, %v2317_v33  ;;  %v2943_v41 = vld [vmem:[#allocation5 + $0xf4] sm:$0xf]  ;;  %v2209_v42 = vld [vmem:[#allocation5 + $0xfc] sm:$0xf0]  ;;  %v2496_v48 = vor.u32 %v3016_v40, %v2495_v38 }
  0x45   :  { %1012 = vmatpush.bf16.msrb.mxu0 %v2544_v54  ;;  %v2128_v43 = vor.u32 %v2922_v34, %v2125_v35  ;;  %v2967_v44 = vld [vmem:[#allocation5 + $0x1b4] sm:$0xf]  ;;  %v2305_v45 = vld [vmem:[#allocation5 + $0x1bc] sm:$0xf0]  ;;  %v2212_v49 = vor.u32 %v2943_v41, %v2209_v42  ;;  %v2483_v50 = vld [vmem:[#allocation5 + $0x318] sm:$0xf] }
  0x46   :  { %1040 = vmatpush.bf16.msrb.mxu2 %v2260_v55  ;;  %v2919_v46 = vld [vmem:[#allocation5 + $0x34] sm:$0xf]  ;;  %v2113_v47 = vld [vmem:[#allocation5 + $0x3c] sm:$0xf0]  ;;  %v2308_v51 = vor.u32 %v2967_v44, %v2305_v45  ;;  %v3013_v52 = vld [vmem:[#allocation5 + $0x320] sm:$0xf0] }
  0x47   :  { %1054 = vmatpush.bf16.msrb.mxu3 %v2356_v60  ;;  %v2940_v53 = vld [vmem:[#allocation5 + $0xdc] sm:$0xf]  ;;  %v2197_v54 = vld [vmem:[#allocation5 + $0xe4] sm:$0xf0]  ;;  %v2116_v55 = vor.u32 %v2919_v46, %v2113_v47  ;;  %v2471_v61 = vld [vmem:[#allocation5 + $0x300] sm:$0xf]  ;;  %v2484_v62 = vor.u32 %v3013_v52, %v2483_v50 }
  0x48   :  { %1026 = vmatpush.bf16.msrb.mxu1 %v2164_v0  ;;  %v2964_v56 = vld [vmem:[#allocation5 + $0x19c] sm:$0xf]  ;;  %v2293_v57 = vld [vmem:[#allocation5 + $0x1a4] sm:$0xf0]  ;;  %v2200_v63 = vor.u32 %v2940_v53, %v2197_v54  ;;  %v3010_v0 = vld [vmem:[#allocation5 + $0x308] sm:$0xf0] }
  0x49   :  { %1013 = vmatpush.bf16.msrb.mxu0 %v2532_v8  ;;  %v2916_v58 = vld [vmem:[#allocation5 + $0x1c] sm:$0xf]  ;;  %v2101_v60 = vld [vmem:[#allocation5 + $0x24] sm:$0xf0]  ;;  %v2937_v1 = vld [vmem:[#allocation5 + $0xc4] sm:$0xf]  ;;  %v2296_v3 = vor.u32 %v2964_v56, %v2293_v57  ;;  %v2472_v16 = vor.u32 %v3010_v0, %v2471_v61 }
  0x4a   :  { %1041 = vmatpush.bf16.msrb.mxu2 %v2248_v9  ;;  %v2185_v2 = vld [vmem:[#allocation5 + $0xcc] sm:$0xf0]  ;;  %v2961_v4 = vld [vmem:[#allocation5 + $0x184] sm:$0xf]  ;;  %v3006_v7 = vld [vmem:[#allocation5 + $0x2ec] sm:$0xf]  ;;  %v2104_v8 = vor.u32 %v2916_v58, %v2101_v60 }
  0x4b   :  { %1055 = vmatpush.bf16.msrb.mxu3 %v2344_v13  ;;  %v2281_v6 = vld [vmem:[#allocation5 + $0x18c] sm:$0xf0]  ;;  %v2461_v9 = vld [vmem:[#allocation5 + $0x2f4] sm:$0xf0]  ;;  %v2936_v11 = vld [vmem:[#allocation5 + $0xb8] sm:$0xf0] }
  0x4c   :  { %1027 = vmatpush.bf16.msrb.mxu1 %v2152_v17  ;;  %v2179_v10 = vld [vmem:[#allocation5 + $0xb0] sm:$0xf]  ;;  %v2960_v14 = vld [vmem:[#allocation5 + $0x178] sm:$0xf0]  ;;  %v2913_v15 = vld [vmem:[#allocation5 + $0x4] sm:$0xf]  ;;  %v2188_v17 = vor.u32 %v2937_v1, %v2185_v2  ;;  %v2284_v21 = vor.u32 %v2961_v4, %v2281_v6  ;;  %v2464_v22 = vor.u32 %v3006_v7, %v2461_v9 }
  0x4d   :  { %1014 = vmatpush.bf16.msrb.mxu0 %v2520_v24  ;;  %v2275_v13 = vld [vmem:[#allocation5 + $0x170] sm:$0xf]  ;;  %v2083_v19 = vld [vmem:[#allocation2 + $0x10] sm:$0xf]  ;;  %v2912_v20 = vld [vmem:[#allocation2 + $0x20] sm:$0xf0]  ;;  %v2180_v26 = vor.u32 %v2936_v11, %v2179_v10 }
  0x4e   :  { %1042 = vmatpush.bf16.msrb.mxu2 %v2236_v25  ;;  %v2089_v18 = vld [vmem:[#allocation5 + $0xc] sm:$0xf0]  ;;  %v3030_v24 = vld [vmem:[#allocation5 + $0x3ac] sm:$0xf]  ;;  %v2557_v25 = vld [vmem:[#allocation5 + $0x3b4] sm:$0xf0]  ;;  %v3446_v32 = vor.u32 %v2912_v20, %v2083_v19 }
  0x4f   :  { %1056 = vmatpush.bf16.msrb.mxu3 %v2332_v27  ;;  %v2276_v27 = vor.u32 %v2960_v14, %v2275_v13  ;;  %v3003_v28 = vld [vmem:[#allocation5 + $0x2d4] sm:$0xf]  ;;  %v2449_v29 = vld [vmem:[#allocation5 + $0x2dc] sm:$0xf0]  ;;  %v2167_v30 = vld [vmem:[#allocation5 + $0x98] sm:$0xf] }
  0x50   :  { %1028 = vmatpush.bf16.msrb.mxu1 %v2140_v31  ;;  %v2092_v31 = vor.u32 %v2913_v15, %v2089_v18  ;;  %v2933_v33 = vld [vmem:[#allocation5 + $0xa0] sm:$0xf0]  ;;  %v2263_v34 = vld [vmem:[#allocation5 + $0x158] sm:$0xf]  ;;  %v3027_v38 = vld [vmem:[#allocation5 + $0x394] sm:$0xf] }
  0x51   :  { %1015 = vmatpush.bf16.msrb.mxu0 %v2508_v36  ;;  %v2957_v35 = vld [vmem:[#allocation5 + $0x160] sm:$0xf0]  ;;  %v2560_v36 = vor.u32 %v3030_v24, %v2557_v25  ;;  %v2168_v40 = vor.u32 %v2933_v33, %v2167_v30  ;;  %v3000_v42 = vld [vmem:[#allocation5 + $0x2bc] sm:$0xf]  ;;  %v2155_v44 = vld [vmem:[#allocation5 + $0x80] sm:$0xf] }
  0x52   :  { %1043 = vmatpush.bf16.msrb.mxu2 %v2224_v37  ;;  %v2452_v37 = vor.u32 %v3003_v28, %v2449_v29  ;;  %v2264_v41 = vor.u32 %v2957_v35, %v2263_v34  ;;  %v2930_v45 = vld [vmem:[#allocation5 + $0x88] sm:$0xf0]  ;;  %v2251_v46 = vld [vmem:[#allocation5 + $0x140] sm:$0xf]  ;;  %v3024_v50 = vld [vmem:[#allocation5 + $0x37c] sm:$0xf] }
  0x53   :  { %1057 = vmatpush.bf16.msrb.mxu3 %v2320_v39  ;;  %v2545_v39 = vld [vmem:[#allocation5 + $0x39c] sm:$0xf0]  ;;  %v2954_v47 = vld [vmem:[#allocation5 + $0x148] sm:$0xf0]  ;;  %v2156_v52 = vor.u32 %v2930_v45, %v2155_v44  ;;  %v2997_v54 = vld [vmem:[#allocation5 + $0x2a4] sm:$0xf] }
  0x54   :  { %1029 = vmatpush.bf16.msrb.mxu1 %v2128_v43  ;;  %v2437_v43 = vld [vmem:[#allocation5 + $0x2c4] sm:$0xf0]  ;;  %v2252_v53 = vor.u32 %v2954_v47, %v2251_v46  ;;  %v2927_v57 = vld [vmem:[#allocation5 + $0x70] sm:$0xf0]  ;;  %v2521_v0 = vld [vmem:[#allocation5 + $0x36c] sm:$0xf0] }
  0x55   :  { %1016 = vmatpush.bf16.msrb.mxu0 %v2496_v48  ;;  %v2548_v48 = vor.u32 %v3027_v38, %v2545_v39  ;;  %v2143_v56 = vld [vmem:[#allocation5 + $0x68] sm:$0xf]  ;;  %v2951_v60 = vld [vmem:[#allocation5 + $0x130] sm:$0xf0]  ;;  %v2413_v4 = vld [vmem:[#allocation5 + $0x294] sm:$0xf0] }
  0x56   :  { %1044 = vmatpush.bf16.msrb.mxu2 %v2212_v49  ;;  %v2440_v49 = vor.u32 %v3000_v42, %v2437_v43  ;;  %v2239_v58 = vld [vmem:[#allocation5 + $0x128] sm:$0xf]  ;;  %v2144_v1 = vor.u32 %v2927_v57, %v2143_v56  ;;  %v2131_v6 = vld [vmem:[#allocation5 + $0x50] sm:$0xf]  ;;  %v2924_v7 = vld [vmem:[#allocation5 + $0x58] sm:$0xf0] }
  0x57   :  { %1058 = vmatpush.bf16.msrb.mxu3 %v2308_v51  ;;  %v2533_v51 = vld [vmem:[#allocation5 + $0x384] sm:$0xf0]  ;;  %v2240_v2 = vor.u32 %v2951_v60, %v2239_v58  ;;  %v2948_v9 = vld [vmem:[#allocation5 + $0x118] sm:$0xf0]  ;;  %v3018_v13 = vld [vmem:[#allocation5 + $0x34c] sm:$0xf]  ;;  %v2132_v15 = vor.u32 %v2924_v7, %v2131_v6 }
  0x58   :  { %1030 = vmatpush.bf16.msrb.mxu1 %v2116_v55  ;;  %v2425_v55 = vld [vmem:[#allocation5 + $0x2ac] sm:$0xf0]  ;;  %v2536_v61 = vor.u32 %v3024_v50, %v2533_v51  ;;  %v2509_v14 = vld [vmem:[#allocation5 + $0x354] sm:$0xf0]  ;;  %v2401_v18 = vld [vmem:[#allocation5 + $0x27c] sm:$0xf0] }
  0x59   :  { %1017 = vmatpush.bf16.msrb.mxu0 %v2484_v62  ;;  %v2428_v62 = vor.u32 %v2997_v54, %v2425_v55  ;;  %v2119_v19 = vld [vmem:[#allocation5 + $0x38] sm:$0xf]  ;;  %v2921_v20 = vld [vmem:[#allocation5 + $0x40] sm:$0xf0]  ;;  %v2512_v24 = vor.u32 %v3018_v13, %v2509_v14  ;;  %v2988_v30 = vld [vmem:[#allocation5 + $0x25c] sm:$0xf] }
  0x5a   :  { %1045 = vmatpush.bf16.msrb.mxu2 %v2200_v63  ;;  %v3021_v63 = vld [vmem:[#allocation5 + $0x364] sm:$0xf]  ;;  %v2120_v28 = vor.u32 %v2921_v20, %v2119_v19  ;;  %v2107_v33 = vld [vmem:[#allocation5 + $0x20] sm:$0xf]  ;;  %v2918_v34 = vld [vmem:[#allocation5 + $0x28] sm:$0xf0] }
  0x5b   :  { %1059 = vmatpush.bf16.msrb.mxu3 %v2296_v3  ;;  %v2994_v3 = vld [vmem:[#allocation5 + $0x28c] sm:$0xf]  ;;  %v2524_v10 = vor.u32 %v3021_v63, %v2521_v0  ;;  %v2203_v35 = vld [vmem:[#allocation5 + $0xe0] sm:$0xf]  ;;  %v3012_v39 = vld [vmem:[#allocation5 + $0x31c] sm:$0xf]  ;;  %v2108_v42 = vor.u32 %v2918_v34, %v2107_v33 }
  0x5c   :  { %1031 = vmatpush.bf16.msrb.mxu1 %v2104_v8  ;;  %v2227_v8 = vld [vmem:[#allocation5 + $0x110] sm:$0xf]  ;;  %v2416_v11 = vor.u32 %v2994_v3, %v2413_v4  ;;  %v2095_v45 = vld [vmem:[#allocation5 + $0x8] sm:$0xf]  ;;  %v2915_v46 = vld [vmem:[#allocation5 + $0x10] sm:$0xf0] }
  0x5d   :  { %1018 = vmatpush.bf16.msrb.mxu0 %v2472_v16  ;;  %v2228_v16 = vor.u32 %v2948_v9, %v2227_v8  ;;  %v2377_v44 = vld [vmem:[#allocation5 + $0x24c] sm:$0xf0]  ;;  %v2191_v47 = vld [vmem:[#allocation5 + $0xc8] sm:$0xf]  ;;  %v2984_v51 = vld [vmem:[#allocation5 + $0x238] sm:$0xf0]  ;;  %v2096_v57 = vor.u32 %v2915_v46, %v2095_v45 }
  0x5e   :  { %1046 = vmatpush.bf16.msrb.mxu2 %v2188_v17  ;;  %v2991_v17 = vld [vmem:[#allocation5 + $0x274] sm:$0xf]  ;;  %v3009_v55 = vld [vmem:[#allocation5 + $0x304] sm:$0xf]  ;;  %v2473_v56 = vld [vmem:[#allocation5 + $0x30c] sm:$0xf0] }
  0x5f   :  { %1060 = vmatpush.bf16.msrb.mxu3 %v2284_v21  ;;  %v2215_v21 = vld [vmem:[#allocation5 + $0xf8] sm:$0xf]  ;;  %v2404_v25 = vor.u32 %v2991_v17, %v2401_v18  ;;  %v2467_v60 = vld [vmem:[#allocation5 + $0x2f0] sm:$0xf]  ;;  %v2981_v4 = vld [vmem:[#allocation5 + $0x220] sm:$0xf0] }
  0x60   :  { %1032 = vmatpush.bf16.msrb.mxu1 %v2092_v31  ;;  %1019 = vmatmul.bf16.vlgmr.msrb.gmra.mxu0 %v3446_v32  ;;  %v2389_v31 = vld [vmem:[#allocation5 + $0x264] sm:$0xf0]  ;;  %v2607_v0 = vld [vmem:[#allocation8 + $0x48] sm:$0xf]  ;;  %v2359_v3 = vld [vmem:[#allocation5 + $0x218] sm:$0xf] }
  0x61   :  { %1067 = vmatpush.bf16.msra.mxu0 %v2464_v22  ;;  %1047 = vmatmul.bf16.vlgmr.msrb.gmra.mxu2 %v3443_v23  ;;  %v2945_v22 = vld [vmem:[#allocation5 + $0x100] sm:$0xf0]  ;;  %v2392_v38 = vor.u32 %v2988_v30, %v2389_v31  ;;  %v2551_v7 = vld [vmem:[#allocation5 + $0x398] sm:$0xf]  ;;  %v2360_v13 = vor.u32 %v2981_v4, %v2359_v3  ;;  %v2347_v17 = vld [vmem:[#allocation5 + $0x200] sm:$0xf] }
  0x62   :  { %1095 = vmatpush.bf16.msra.mxu2 %v2180_v26  ;;  %1061 = vmatmul.bf16.vlgmr.msrb.gmra.mxu3 %v3437_v5  ;;  %v3015_v26 = vld [vmem:[#allocation5 + $0x334] sm:$0xf]  ;;  %v2216_v29 = vor.u32 %v2945_v22, %v2215_v21  ;;  %v3029_v8 = vld [vmem:[#allocation5 + $0x3a0] sm:$0xf0]  ;;  %v2595_v14 = vld [vmem:[#allocation8 + $0x30] sm:$0xf] }
  0x63   :  { %1109 = vmatpush.bf16.msra.mxu3 %v2276_v27  ;;  %1033 = vmatmul.bf16.vlgmr.msrb.gmra.mxu1 %v3434_v59  ;;  %v2497_v27 = vld [vmem:[#allocation5 + $0x33c] sm:$0xf0]  ;;  %v2978_v18 = vld [vmem:[#allocation5 + $0x208] sm:$0xf0]  ;;  %v2335_v30 = vld [vmem:[#allocation5 + $0x1e8] sm:$0xf] }
  0x64   :  { %1081 = vmatpush.bf16.msra.mxu1 %v2560_v36  ;;  %v2942_v36 = vld [vmem:[#allocation5 + $0xe8] sm:$0xf0]  ;;  %v2539_v20 = vld [vmem:[#allocation5 + $0x380] sm:$0xf]  ;;  %v2527_v33 = vld [vmem:[#allocation5 + $0x368] sm:$0xf] }
  0x65   :  { %1068 = vmatpush.bf16.msra.mxu0 %v2452_v37  ;;  %v2500_v37 = vor.u32 %v3015_v26, %v2497_v27  ;;  %v2204_v43 = vor.u32 %v2942_v36, %v2203_v35  ;;  %v3026_v21 = vld [vmem:[#allocation5 + $0x388] sm:$0xf0]  ;;  %v2348_v26 = vor.u32 %v2978_v18, %v2347_v17  ;;  %v2583_v27 = vld [vmem:[#allocation8 + $0x18] sm:$0xf]  ;;  %v3023_v34 = vld [vmem:[#allocation5 + $0x370] sm:$0xf0] }
  0x66   :  { %1096 = vmatpush.bf16.msra.mxu2 %v2168_v40  ;;  %v2485_v40 = vld [vmem:[#allocation5 + $0x324] sm:$0xf0]  ;;  %v2999_v36 = vld [vmem:[#allocation5 + $0x2b0] sm:$0xf0]  ;;  %v2515_v46 = vld [vmem:[#allocation5 + $0x350] sm:$0xf] }
  0x67   :  { %1110 = vmatpush.bf16.msra.mxu3 %v2264_v41  ;;  %v2985_v41 = vld [vmem:[#allocation5 + $0x244] sm:$0xf]  ;;  %v2488_v50 = vor.u32 %v3012_v39, %v2485_v40  ;;  %v2431_v35 = vld [vmem:[#allocation5 + $0x2a8] sm:$0xf]  ;;  %v3035_v39 = vld [vmem:[#allocation8 + $0x8] sm:$0xf0] }
  0x68   :  { %1082 = vmatpush.bf16.msra.mxu1 %v2548_v48  ;;  %v2939_v48 = vld [vmem:[#allocation5 + $0xd0] sm:$0xf0]  ;;  %v2380_v54 = vor.u32 %v2985_v41, %v2377_v44  ;;  %v2323_v40 = vld [vmem:[#allocation5 + $0x1d0] sm:$0xf]  ;;  %v2528_v41 = vor.u32 %v3023_v34, %v2527_v33  ;;  %v2609_v44 = vld [vmem:[#allocation8 + $0x54] sm:$0xf0]  ;;  %v2432_v45 = vor.u32 %v2999_v36, %v2431_v35 }
  0x69   :  { %1069 = vmatpush.bf16.msra.mxu0 %v2440_v49  ;;  %v2371_v49 = vld [vmem:[#allocation5 + $0x230] sm:$0xf]  ;;  %v2192_v58 = vor.u32 %v2939_v48, %v2191_v47  ;;  %v3020_v47 = vld [vmem:[#allocation5 + $0x358] sm:$0xf0]  ;;  %vm1308_vm0 = vcmask 523264   ;;  %s2031_s1 = sshll.u32 %s3586_s7, 4  ;;  %s2032_s1 = int_to_ptr.hbm [resolvable:$true] %s2031_s1 }
  0x6a   :  { %1097 = vmatpush.bf16.msra.mxu2 %v2156_v52  ;;  %v2563_v52 = vld [vmem:[#allocation5 + $0x3b0] sm:$0xf]  ;;  %v2299_v3 = vld [vmem:[#allocation5 + $0x1a0] sm:$0xf]  ;;  %v2287_v17 = vld [vmem:[#allocation5 + $0x188] sm:$0xf] }
  0x6b   :  { %1111 = vmatpush.bf16.msra.mxu3 %v2252_v53  ;;  %v3032_v53 = vld [vmem:[#allocation5 + $0x3b8] sm:$0xf0]  ;;  %v2963_v18 = vld [vmem:[#allocation5 + $0x190] sm:$0xf0]  ;;  %v3042_v35 = vld [vmem:[#allocation8 + $0x40] sm:$0xf0] }
  0x6c   :  { %1083 = vmatpush.bf16.msra.mxu1 %v2536_v61  ;;  %v3008_v61 = vld [vmem:[#allocation5 + $0x2f8] sm:$0xf0]  ;;  %v2564_v63 = vor.u32 %v3032_v53, %v2563_v52  ;;  %v2311_v53 = vld [vmem:[#allocation5 + $0x1b8] sm:$0xf]  ;;  %s3359_s18 = smov 384   ;;  %s3360_s3 = smov 24  }
  0x6d   :  { %1070 = vmatpush.bf16.msra.mxu0 %v2428_v62  ;;  %v2372_v62 = vor.u32 %v2984_v51, %v2371_v49  ;;  %v2468_v6 = vor.u32 %v3008_v61, %v2467_v60  ;;  %v2419_v49 = vld [vmem:[#allocation5 + $0x290] sm:$0xf]  ;;  %v3456_v60 = vld [vmem:[#allocation7] sm:$0xff]  ;;  %v2503_v61 = vld [vmem:[#allocation5 + $0x338] sm:$0xf]  ;;  %s3361_s7 = smov [#allocation14]  }
  0x6e   :  { %1098 = vmatpush.bf16.msra.mxu2 %v2144_v1  ;;  %v3044_v1 = vld [vmem:[#allocation8 + $0x50] sm:$0xf0]  ;;  %s2042_s19 = sshll.u32 %s3361_s7, 4  ;;  %s2044_s22 = sshll.u32 %s3587_s8, 4  ;;  %s2043_s19 = int_to_ptr.vmem [resolvable:$true] %s2042_s19  ;;  %s2045_s22 = int_to_ptr.hbm [resolvable:$true] %s2044_s22 }
  0x6f   :  { %1112 = vmatpush.bf16.msra.mxu3 %v2240_v2  ;;  %v2476_v2 = vor.u32 %v3009_v55, %v2473_v56  ;;  %v2608_v9 = vor.u32 %v3044_v1, %v2607_v0  ;;  %v2969_v55 = vld [vmem:[#allocation5 + $0x1c0] sm:$0xf0]  ;;  %v3040_v56 = vld [vmem:[#allocation8 + $0x34] sm:$0xf] }
  0x70   :  { %1084 = vmatpush.bf16.msra.mxu1 %v2524_v10  ;;  %v2455_v10 = vld [vmem:[#allocation5 + $0x2d8] sm:$0xf]  ;;  %v2993_v0 = vld [vmem:[#allocation5 + $0x280] sm:$0xf0]  ;;  %v2312_v1 = vor.u32 %v2969_v55, %v2311_v53  ;;  %v3059_v53 = vld [vmem:[#allocation10 + $0x68] sm:$0xf0] }
  0x71   :  { %1071 = vmatpush.bf16.msra.mxu0 %v2416_v11  ;;  %v3005_v11 = vld [vmem:[#allocation5 + $0x2e0] sm:$0xf0]  ;;  %v2696_v55 = vld [vmem:[#allocation10 + $0x9c] sm:$0xf0] }
  0x72   :  { %1099 = vmatpush.bf16.msra.mxu2 %v2132_v15  ;;  %v3041_v15 = vld [vmem:[#allocation8 + $0x38] sm:$0xf0]  ;;  %v2456_v19 = vor.u32 %v3005_v11, %v2455_v10  ;;  %v2491_v10 = vld [vmem:[#allocation5 + $0x320] sm:$0xf]  ;;  %v3014_v11 = vld [vmem:[#allocation5 + $0x328] sm:$0xf0] }
  0x73   :  { %1113 = vmatpush.bf16.msra.mxu3 %v2228_v16  ;;  %v2552_v16 = vor.u32 %v3029_v8, %v2551_v7  ;;  %v2596_v22 = vor.u32 %v3041_v15, %v2595_v14  ;;  %v3037_v7 = vld [vmem:[#allocation8 + $0x1c] sm:$0xf]  ;;  %v2585_v8 = vld [vmem:[#allocation8 + $0x24] sm:$0xf0]  ;;  %v2990_v14 = vld [vmem:[#allocation5 + $0x268] sm:$0xf0] }
  0x74   :  { %1085 = vmatpush.bf16.msra.mxu1 %v2512_v24  ;;  %v2443_v24 = vld [vmem:[#allocation5 + $0x2c0] sm:$0xf] }
  0x75   :  { %1072 = vmatpush.bf16.msra.mxu0 %v2404_v25  ;;  %v3002_v25 = vld [vmem:[#allocation5 + $0x2c8] sm:$0xf0] }
  0x76   :  { %1100 = vmatpush.bf16.msra.mxu2 %v2120_v28  ;;  %v3038_v28 = vld [vmem:[#allocation8 + $0x20] sm:$0xf0]  ;;  %v2444_v31 = vor.u32 %v3002_v25, %v2443_v24  ;;  %v3011_v25 = vld [vmem:[#allocation5 + $0x310] sm:$0xf0] }
  0x77   :  { %1114 = vmatpush.bf16.msra.mxu3 %v2216_v29  ;;  %v2540_v29 = vor.u32 %v3026_v21, %v2539_v20  ;;  %v2479_v20 = vld [vmem:[#allocation5 + $0x308] sm:$0xf]  ;;  %v3034_v21 = vld [vmem:[#allocation8 + $0x4] sm:$0xf] }
  0x78   :  { %1086 = vmatpush.bf16.msra.mxu1 %v2500_v37 }
  0x79   :  { %1073 = vmatpush.bf16.msra.mxu0 %v2392_v38  ;;  %v2571_v38 = vld [vmem:[#allocation8] sm:$0xf] }
  0x7a   :  { %1101 = vmatpush.bf16.msra.mxu2 %v2108_v42  ;;  %v2972_v42 = vld [vmem:[#allocation5 + $0x1d8] sm:$0xf0]  ;;  %v2572_v48 = vor.u32 %v3035_v39, %v2571_v38  ;;  %v3039_v38 = vld [vmem:[#allocation8 + $0x28] sm:$0xf0] }
  0x7b   :  { %1115 = vmatpush.bf16.msra.mxu3 %v2204_v43  ;;  %v3043_v43 = vld [vmem:[#allocation8 + $0x4c] sm:$0xf]  ;;  %v2324_v51 = vor.u32 %v2972_v42, %v2323_v40  ;;  %v2579_v40 = vld [vmem:[#allocation8 + $0x8] sm:$0xf] }
  0x7c   :  { %1087 = vmatpush.bf16.msra.mxu1 %v2488_v50  ;;  %v2996_v50 = vld [vmem:[#allocation5 + $0x298] sm:$0xf0]  ;;  %v2612_v52 = vor.u32 %v3043_v43, %v2609_v44  ;;  %v2706_v43 = vld [vmem:[#allocation10 + $0xa8] sm:$0xf] }
  0x7d   :  { %1074 = vmatpush.bf16.msra.mxu0 %v2380_v54  ;;  %v2516_v54 = vor.u32 %v3020_v47, %v2515_v46  ;;  %v3068_v44 = vld [vmem:[#allocation10 + $0xb0] sm:$0xf0]  ;;  %v2682_v46 = vld [vmem:[#allocation10 + $0x78] sm:$0xf]  ;;  %v3062_v47 = vld [vmem:[#allocation10 + $0x80] sm:$0xf0] }
  0x7e   :  { %1102 = vmatpush.bf16.msra.mxu2 %v2096_v57  ;;  %v2597_v57 = vld [vmem:[#allocation8 + $0x3c] sm:$0xf0] }
  0x7f   :  { %1116 = vmatpush.bf16.msra.mxu3 %v2192_v58  ;;  %v2420_v58 = vor.u32 %v2996_v50, %v2419_v49  ;;  %v2708_v49 = vld [vmem:[#allocation10 + $0xb4] sm:$0xf0] }
  0x80   :  { %1088 = vmatpush.bf16.msra.mxu1 %v2476_v2  ;;  %1075 = vmatmul.bf16.vlgmr.msra.gmra.mxu0 %v3439_v12  ;;  %v2600_v2 = vor.u32 %v3040_v56, %v2597_v57 }
  0x81   :  { %1123 = vmatpush.bf16.msrb.mxu0 %v2372_v62  ;;  %1103 = vmatmul.bf16.vlgmr.msra.gmra.mxu2 %v3434_v59  ;;  %v2584_v59 = vor.u32 %v3038_v28, %v2583_v27  ;;  %v3017_v62 = vld [vmem:[#allocation5 + $0x340] sm:$0xf0]  ;;  %v2383_v28 = vld [vmem:[#allocation5 + $0x248] sm:$0xf] }
  0x82   :  { %1151 = vmatpush.bf16.msrb.mxu2 %v2564_v63  ;;  %1117 = vmatmul.bf16.vlgmr.msra.gmra.mxu3 %v3443_v23  ;;  %v2975_v23 = vld [vmem:[#allocation5 + $0x1f0] sm:$0xf0]  ;;  %v2407_v63 = vld [vmem:[#allocation5 + $0x278] sm:$0xf]  ;;  %v2504_v4 = vor.u32 %v3017_v62, %v2503_v61  ;;  %v3045_v27 = vld [vmem:[#allocation8 + $0x58] sm:$0xf0] }
  0x83   :  { %1316 = vmatpush.bf16.msrb.mxu3 %v2608_v9  ;;  %1089 = vmatmul.bf16.vlgmr.msra.gmra.mxu1 %v3446_v32  ;;  %v2336_v37 = vor.u32 %v2975_v23, %v2335_v30  ;;  %v2408_v9 = vor.u32 %v2993_v0, %v2407_v63  ;;  %v2288_v30 = vor.u32 %v2963_v18, %v2287_v17  ;;  %v2646_v62 = vld [vmem:[#allocation10 + $0x30] sm:$0xf]  ;;  %v3053_v63 = vld [vmem:[#allocation10 + $0x38] sm:$0xf0]  ;;  %v2802_v18 = vld [vmem:[#allocation10 + $0x168] sm:$0xf] }
  0x84   :  { %1137 = vmatpush.bf16.msrb.mxu1 %v2468_v6  ;;  %v2966_v6 = vld [vmem:[#allocation5 + $0x1a8] sm:$0xf0]  ;;  %v2647_v0 = vor.u32 %v3053_v63, %v2646_v62  ;;  %v2810_v63 = vld [vmem:[#allocation10 + $0x170] sm:$0xf] }
  0x85   :  { %1124 = vmatpush.bf16.msrb.mxu0 %v2360_v13  ;;  %v2395_v13 = vld [vmem:[#allocation5 + $0x260] sm:$0xf]  ;;  %v2300_v15 = vor.u32 %v2966_v6, %v2299_v3 }
  0x86   :  { %1152 = vmatpush.bf16.msrb.mxu2 %v2552_v16  ;;  %v2588_v16 = vor.u32 %v3037_v7, %v2585_v8  ;;  %v2396_v24 = vor.u32 %v2990_v14, %v2395_v13  ;;  %v2634_v6 = vld [vmem:[#allocation10 + $0x18] sm:$0xf]  ;;  %v3050_v7 = vld [vmem:[#allocation10 + $0x20] sm:$0xf0]  ;;  %v2622_v14 = vld [vmem:[#allocation10] sm:$0xf] }
  0x87   :  { %1317 = vmatpush.bf16.msrb.mxu3 %v2596_v22  ;;  %v2573_v22 = vld [vmem:[#allocation8 + $0xc] sm:$0xf0]  ;;  %v2635_v8 = vor.u32 %v3050_v7, %v2634_v6  ;;  %v2754_v7 = vld [vmem:[#allocation10 + $0x108] sm:$0xf] }
  0x88   :  { %1138 = vmatpush.bf16.msrb.mxu1 %v2456_v19  ;;  %v2492_v19 = vor.u32 %v3014_v11, %v2491_v10  ;;  %v2576_v23 = vor.u32 %v3034_v21, %v2573_v22  ;;  %v2672_v10 = vld [vmem:[#allocation10 + $0x6c] sm:$0xf0]  ;;  %v2660_v22 = vld [vmem:[#allocation10 + $0x54] sm:$0xf0] }
  0x89   :  { %1125 = vmatpush.bf16.msrb.mxu0 %v2348_v26  ;;  %v2615_v26 = vld [vmem:[#allocation8 + $0x50] sm:$0xf] }
  0x8a   :  { %1153 = vmatpush.bf16.msrb.mxu2 %v2540_v29  ;;  %v2987_v29 = vld [vmem:[#allocation5 + $0x250] sm:$0xf0]  ;;  %v2616_v33 = vor.u32 %v3045_v27, %v2615_v26 }
  0x8b   :  { %1318 = vmatpush.bf16.msrb.mxu3 %v2584_v59  ;;  %v2384_v34 = vor.u32 %v2987_v29, %v2383_v28  ;;  %v2603_v59 = vld [vmem:[#allocation8 + $0x38] sm:$0xf]  ;;  %v2790_v29 = vld [vmem:[#allocation10 + $0x150] sm:$0xf] }
  0x8c   :  { %1139 = vmatpush.bf16.msrb.mxu1 %v2444_v31  ;;  %v2480_v31 = vor.u32 %v3011_v25, %v2479_v20  ;;  %v2604_v36 = vor.u32 %v3042_v35, %v2603_v59  ;;  %v3055_v20 = vld [vmem:[#allocation10 + $0x4c] sm:$0xf]  ;;  %v2804_v25 = vld [vmem:[#allocation10 + $0x174] sm:$0xf0]  ;;  %v2792_v59 = vld [vmem:[#allocation10 + $0x15c] sm:$0xf0] }
  0x8d   :  { %1126 = vmatpush.bf16.msrb.mxu0 %v2336_v37  ;;  %v2591_v37 = vld [vmem:[#allocation8 + $0x20] sm:$0xf]  ;;  %v2663_v26 = vor.u32 %v3055_v20, %v2660_v22 }
  0x8e   :  { %1154 = vmatpush.bf16.msrb.mxu2 %v2528_v41  ;;  %v2592_v39 = vor.u32 %v3039_v38, %v2591_v37  ;;  %v3036_v41 = vld [vmem:[#allocation8 + $0x10] sm:$0xf0]  ;;  %v2898_v38 = vld [vmem:[#allocation10 + $0x228] sm:$0xf]  ;;  %v2862_v22 = vld [vmem:[#allocation10 + $0x1e0] sm:$0xf] }
  0x8f   :  { %1319 = vmatpush.bf16.msrb.mxu3 %v2572_v48  ;;  %v2580_v42 = vor.u32 %v3036_v41, %v2579_v40  ;;  %v3067_v48 = vld [vmem:[#allocation10 + $0xac] sm:$0xf] }
  0x90   :  { %1140 = vmatpush.bf16.msrb.mxu1 %v2432_v45  ;;  %v3065_v45 = vld [vmem:[#allocation10 + $0x98] sm:$0xf0]  ;;  %v2711_v50 = vor.u32 %v3067_v48, %v2708_v49  ;;  %v2886_v49 = vld [vmem:[#allocation10 + $0x210] sm:$0xf] }
  0x91   :  { %1127 = vmatpush.bf16.msrb.mxu0 %v2324_v51  ;;  %v2683_v51 = vor.u32 %v3062_v47, %v2682_v46 }
  0x92   :  { %1155 = vmatpush.bf16.msrb.mxu2 %v2516_v54  ;;  %2617 = vmatmul.msk.bf16.vlgmr.msrb.gmra.mxu3 %vm1308_vm0, %v3456_v60  ;;  %v3064_v54 = vld [vmem:[#allocation10 + $0x94] sm:$0xf] }
  0x93   :  { %1330 = vmatpush.bf16.msra.mxu3 %v2612_v52  ;;  %v2670_v52 = vld [vmem:[#allocation10 + $0x60] sm:$0xf]  ;;  %v2699_v56 = vor.u32 %v3064_v54, %v2696_v55  ;;  %v3083_v54 = vld [vmem:[#allocation10 + $0x128] sm:$0xf0]  ;;  %v3046_v55 = vld [vmem:[#allocation10 + $0x4] sm:$0xf] }
  0x94   :  { %1141 = vmatpush.bf16.msrb.mxu1 %v2420_v58  ;;  %v2671_v57 = vor.u32 %v3059_v53, %v2670_v52  ;;  %v2658_v58 = vld [vmem:[#allocation10 + $0x48] sm:$0xf] }
  0x95   :  { %1128 = vmatpush.bf16.msrb.mxu0 %v2312_v1  ;;  %v3061_v1 = vld [vmem:[#allocation10 + $0x7c] sm:$0xf] }
  0x96   :  { %1156 = vmatpush.bf16.msrb.mxu2 %v2504_v4 }
  0x97   :  { %1331 = vmatpush.bf16.msra.mxu3 %v2600_v2  ;;  %v2684_v2 = vld [vmem:[#allocation10 + $0x84] sm:$0xf0] }
  0x98   :  { %1142 = vmatpush.bf16.msrb.mxu1 %v2408_v9  ;;  %v2687_v4 = vor.u32 %v3061_v1, %v2684_v2  ;;  %v3058_v9 = vld [vmem:[#allocation10 + $0x64] sm:$0xf]  ;;  %v2874_v2 = vld [vmem:[#allocation10 + $0x1f8] sm:$0xf] }
  0x99   :  { %1129 = vmatpush.bf16.msrb.mxu0 %v2300_v15  ;;  %v2675_v11 = vor.u32 %v3058_v9, %v2672_v10  ;;  %v3047_v15 = vld [vmem:[#allocation10 + $0x8] sm:$0xf0] }
  0x9a   :  { %1157 = vmatpush.bf16.msrb.mxu2 %v2492_v19  ;;  %v2623_v17 = vor.u32 %v3047_v15, %v2622_v14  ;;  %v3092_v19 = vld [vmem:[#allocation10 + $0x170] sm:$0xf0]  ;;  %v3079_v9 = vld [vmem:[#allocation10 + $0x10c] sm:$0xf]  ;;  %v2756_v14 = vld [vmem:[#allocation10 + $0x114] sm:$0xf0] }
  0x9b   :  { %1332 = vmatpush.bf16.msra.mxu3 %v2588_v16  ;;  %v2803_v21 = vor.u32 %v3092_v19, %v2802_v18  ;;  %v2798_v15 = vld [vmem:[#allocation10 + $0x158] sm:$0xf]  ;;  %v2759_v20 = vor.u32 %v3079_v9, %v2756_v14  ;;  %v2888_v14 = vld [vmem:[#allocation10 + $0x21c] sm:$0xf0] }
  0x9c   :  { %1143 = vmatpush.bf16.msrb.mxu1 %v2396_v24  ;;  %v3091_v24 = vld [vmem:[#allocation10 + $0x16c] sm:$0xf] }
  0x9d   :  { %1130 = vmatpush.bf16.msrb.mxu0 %v2288_v30  ;;  %v2807_v27 = vor.u32 %v3091_v24, %v2804_v25  ;;  %v3089_v30 = vld [vmem:[#allocation10 + $0x158] sm:$0xf0]  ;;  %v3107_v24 = vld [vmem:[#allocation10 + $0x1e8] sm:$0xf0] }
  0x9e   :  { %1158 = vmatpush.bf16.msrb.mxu2 %v2480_v31  ;;  %v2791_v31 = vor.u32 %v3089_v30, %v2790_v29  ;;  %v2863_v25 = vor.u32 %v3107_v24, %v2862_v22  ;;  %v3076_v29 = vld [vmem:[#allocation10 + $0xf4] sm:$0xf]  ;;  %v2814_v24 = vld [vmem:[#allocation10 + $0x180] sm:$0xf] }
  0x9f   :  { %1333 = vmatpush.bf16.msra.mxu3 %v2576_v23  ;;  %v3052_v23 = vld [vmem:[#allocation10 + $0x34] sm:$0xf] }
  0xa0   :  { %1144 = vmatpush.bf16.msrb.mxu1 %v2384_v34  ;;  %1131 = vmatmul.bf16.vlgmr.msrb.gmra.mxu0 %v3437_v5  ;;  %v2707_v5 = vor.u32 %v3068_v44, %v2706_v43  ;;  %v3088_v34 = vld [vmem:[#allocation10 + $0x154] sm:$0xf]  ;;  %v3086_v43 = vld [vmem:[#allocation10 + $0x140] sm:$0xf0]  ;;  %v3049_v44 = vld [vmem:[#allocation10 + $0x1c] sm:$0xf] }
  0xa1   :  { %1344 = vmatpush.bf16.msra.mxu0 %v2616_v33  ;;  %1159 = vmatmul.bf16.vlgmr.msrb.gmra.mxu2 %v3446_v32  ;;  %v2694_v32 = vld [vmem:[#allocation10 + $0x90] sm:$0xf]  ;;  %v2648_v33 = vld [vmem:[#allocation10 + $0x3c] sm:$0xf0] }
  0xa2   :  { %2618 = vmatmul.msk.bf16.vlgmr.msra.gmra.mxu3 %vm1308_vm0, %v3456_v60  ;;  %1865 = vmatpush.bf16.msra.mxu2 %v2803_v21  ;;  %v2651_v35 = vor.u32 %v3052_v23, %v2648_v33  ;;  %v2786_v33 = vld [vmem:[#allocation10 + $0x140] sm:$0xf] }
  0xa3   :  { %1145 = vmatmul.bf16.vlgmr.msrb.gmra.mxu1 %v3439_v12  ;;  %v2695_v12 = vor.u32 %v3065_v45, %v2694_v32  ;;  %v2636_v32 = vld [vmem:[#allocation10 + $0x24] sm:$0xf0]  ;;  %v3085_v45 = vld [vmem:[#allocation10 + $0x13c] sm:$0xf] }
  0xa4   :  { %1851 = vmatpush.bf16.msra.mxu1 %v2707_v5  ;;  %v2639_v47 = vor.u32 %v3049_v44, %v2636_v32  ;;  %v2732_v32 = vld [vmem:[#allocation10 + $0xe4] sm:$0xf0] }
  0xa5   :  { %1345 = vmatpush.bf16.msra.mxu0 %v2604_v36  ;;  %v2795_v36 = vor.u32 %v3088_v34, %v2792_v59  ;;  %v3087_v34 = vld [vmem:[#allocation10 + $0x148] sm:$0xf0] }
  0xa6   :  { %1866 = vmatpush.bf16.msra.mxu2 %v2791_v31  ;;  %v2744_v31 = vld [vmem:[#allocation10 + $0xfc] sm:$0xf0] }
  0xa7   :  { %v2747_v59 = vor.u32 %v3076_v29, %v2744_v31  ;;  %v2714_v29 = vld [vmem:[#allocation10 + $0xb0] sm:$0xf] }
  0xa8   :  { %1852 = vmatpush.bf16.msra.mxu1 %v2695_v12  ;;  %v2780_v12 = vld [vmem:[#allocation10 + $0x144] sm:$0xf0] }
  0xa9   :  { %1346 = vmatpush.bf16.msra.mxu0 %v2592_v39  ;;  %v3116_v39 = vld [vmem:[#allocation10 + $0x230] sm:$0xf0]  ;;  %v2783_v48 = vor.u32 %v3085_v45, %v2780_v12  ;;  %v2774_v45 = vld [vmem:[#allocation10 + $0x128] sm:$0xf] }
  0xaa   :  { %v2899_v41 = vor.u32 %v3116_v39, %v2898_v38  ;;  %v3104_v38 = vld [vmem:[#allocation10 + $0x1d0] sm:$0xf0] }
  0xab   :  { %v3084_v12 = vld [vmem:[#allocation10 + $0x130] sm:$0xf0] }
  0xac   :  { %1853 = vmatpush.bf16.msra.mxu1 %v2683_v51  ;;  %1879 = vmatpush.bf16.msrb.mxu3 %v2899_v41  ;;  %v2766_v51 = vld [vmem:[#allocation10 + $0x120] sm:$0xf]  ;;  %v2730_v41 = vld [vmem:[#allocation10 + $0xd8] sm:$0xf] }
  0xad   :  { %1347 = vmatpush.bf16.msra.mxu0 %v2580_v42  ;;  %v2778_v42 = vld [vmem:[#allocation10 + $0x138] sm:$0xf] }
  0xae   :  { %v2779_v5 = vor.u32 %v3086_v43, %v2778_v42  ;;  %v3074_v42 = vld [vmem:[#allocation10 + $0xe0] sm:$0xf0]  ;;  %v3073_v43 = vld [vmem:[#allocation10 + $0xdc] sm:$0xf] }
  0xb0   :  { %2619 = vmatmul.msk.bf16.vlgmr.msra.gmra.mxu0 %vm1308_vm0, %v3456_v60  ;;  %v3056_v60 = vld [vmem:[#allocation10 + $0x50] sm:$0xf0]  ;;  %1854 = vmatpush.bf16.msra.mxu1 %v2671_v57  ;;  %v2767_v57 = vor.u32 %v3083_v54, %v2766_v51 }
  0xb1   :  { %1893 = vmatpush.bf16.msrb.mxu0 %v2711_v50  ;;  %v2659_v61 = vor.u32 %v3056_v60, %v2658_v58  ;;  %v3113_v50 = vld [vmem:[#allocation10 + $0x218] sm:$0xf0]  ;;  %1867 = vmatpush.bf16.msra.mxu2 %v2779_v5  ;;  %v3082_v60 = vld [vmem:[#allocation10 + $0x124] sm:$0xf]  ;;  %v2731_v5 = vor.u32 %v3074_v42, %v2730_v41  ;;  %v2702_v42 = vld [vmem:[#allocation10 + $0x98] sm:$0xf] }
  0xb2   :  { %v2887_v53 = vor.u32 %v3113_v50, %v2886_v49  ;;  %v2838_v49 = vld [vmem:[#allocation10 + $0x1b0] sm:$0xf]  ;;  %v3101_v50 = vld [vmem:[#allocation10 + $0x1b8] sm:$0xf0] }
  0xb3   :  { %v2839_v54 = vor.u32 %v3101_v50, %v2838_v49 }
  0xb4   :  { %1855 = vmatpush.bf16.msra.mxu1 %v2659_v61  ;;  %v2768_v61 = vld [vmem:[#allocation10 + $0x12c] sm:$0xf0]  ;;  %1880 = vmatpush.bf16.msrb.mxu3 %v2887_v53 }
  0xb5   :  { %1894 = vmatpush.bf16.msrb.mxu0 %v2699_v56  ;;  %v2624_v56 = vld [vmem:[#allocation10 + $0xc] sm:$0xf0]  ;;  %v2771_v62 = vor.u32 %v3082_v60, %v2768_v61  ;;  %1868 = vmatpush.bf16.msra.mxu2 %v2767_v57  ;;  %v3070_v57 = vld [vmem:[#allocation10 + $0xc4] sm:$0xf]  ;;  %v3115_v61 = vld [vmem:[#allocation10 + $0x22c] sm:$0xf] }
  0xb6   :  { %v2627_v58 = vor.u32 %v3046_v55, %v2624_v56  ;;  %v2718_v55 = vld [vmem:[#allocation10 + $0xc0] sm:$0xf]  ;;  %v3071_v56 = vld [vmem:[#allocation10 + $0xc8] sm:$0xf0]  ;;  %v2720_v60 = vld [vmem:[#allocation10 + $0xcc] sm:$0xf0] }
  0xb8   :  { %1856 = vmatpush.bf16.msra.mxu1 %v2647_v0  ;;  %v3093_v0 = vld [vmem:[#allocation10 + $0x178] sm:$0xf0] }
  0xb9   :  { %1895 = vmatpush.bf16.msrb.mxu0 %v2687_v4  ;;  %v2811_v1 = vor.u32 %v3093_v0, %v2810_v63  ;;  %v3110_v4 = vld [vmem:[#allocation10 + $0x200] sm:$0xf0]  ;;  %v2723_v63 = vor.u32 %v3070_v57, %v2720_v60 }
  0xba   :  { %v2875_v6 = vor.u32 %v3110_v4, %v2874_v2  ;;  %v3081_v2 = vld [vmem:[#allocation10 + $0x118] sm:$0xf0] }
  0xbc   :  { %1857 = vmatpush.bf16.msra.mxu1 %v2635_v8  ;;  %v3080_v8 = vld [vmem:[#allocation10 + $0x110] sm:$0xf0]  ;;  %1881 = vmatpush.bf16.msrb.mxu3 %v2875_v6 }
  0xbd   :  { %v3469_v13 = vpop.f32.mrf.mxu0  ;;  %1896 = vmatpush.bf16.msrb.mxu0 %v2675_v11  ;;  %v2755_v11 = vor.u32 %v3080_v8, %v2754_v7  ;;  %v2826_v7 = vld [vmem:[#allocation10 + $0x198] sm:$0xf]  ;;  %v3098_v8 = vld [vmem:[#allocation10 + $0x1a0] sm:$0xf0] }
  0xbe   :  { %v2827_v9 = vor.u32 %v3098_v8, %v2826_v7  ;;  %v3100_v8 = vld [vmem:[#allocation10 + $0x1b4] sm:$0xf] }
  0xbf   :  { %1869 = vmatpush.bf16.msra.mxu2 %v2755_v11  ;;  %v3112_v11 = vld [vmem:[#allocation10 + $0x214] sm:$0xf] }
  0xc0   :  { %v3471_v16 = vpop.f32.mrf.mxu1  ;;  %1858 = vmatpush.bf16.msra.mxu1 %v2623_v17  ;;  %v3090_v17 = vld [vmem:[#allocation10 + $0x160] sm:$0xf0]  ;;  %1882 = vmatpush.bf16.msrb.mxu3 %v2863_v25  ;;  %v3095_v25 = vld [vmem:[#allocation10 + $0x188] sm:$0xf0] }
  0xc1   :  { %1897 = vmatpush.bf16.msrb.mxu0 %v2663_v26  ;;  %v2799_v21 = vor.u32 %v3090_v17, %v2798_v15  ;;  %v2742_v26 = vld [vmem:[#allocation10 + $0xf0] sm:$0xf]  ;;  %v2750_v15 = vld [vmem:[#allocation10 + $0xf8] sm:$0xf]  ;;  %v2891_v17 = vor.u32 %v3112_v11, %v2888_v14  ;;  %v979_v57 = vadd.f32 %v3471_v16, %v3469_v13  ;;  %v2678_v13 = vld [vmem:[#allocation10 + $0x68] sm:$0xf] }
  0xc2   :  { %v3060_v16 = vld [vmem:[#allocation10 + $0x70] sm:$0xf0] }
  0xc3   :  { %v2679_v7 = vor.u32 %v3060_v16, %v2678_v13 }
  0xc4   :  { %1907 = vmatpush.bf16.msrb.mxu1 %v2807_v27  ;;  %v3475_v37 = vpop.f32.mrf.mxu2  ;;  %v3077_v27 = vld [vmem:[#allocation10 + $0xf8] sm:$0xf0] }
  0xc5   :  { %v3467_v3 = vpop.f32.mrf.mxu3  ;;  %v3477_v40 = vpop.f32.mrf.mxu0  ;;  %1898 = vmatpush.bf16.msrb.mxu0 %v2651_v35  ;;  %v2743_v23 = vor.u32 %v3077_v27, %v2742_v26  ;;  %v2787_v35 = vor.u32 %v3087_v34, %v2786_v33  ;;  %v2815_v27 = vor.u32 %v3095_v25, %v2814_v24  ;;  %v3109_v33 = vld [vmem:[#allocation10 + $0x1fc] sm:$0xf]  ;;  %v2876_v34 = vld [vmem:[#allocation10 + $0x204] sm:$0xf0] }
  0xc6   :  { %v3097_v25 = vld [vmem:[#allocation10 + $0x19c] sm:$0xf] }
  0xc7   :  { %1870 = vmatpush.bf16.msra.mxu2 %v2743_v23  ;;  %v3069_v23 = vld [vmem:[#allocation10 + $0xb8] sm:$0xf0] }
  0xc8   :  { %1908 = vmatpush.bf16.msrb.mxu1 %v2795_v36  ;;  %v3479_v46 = vpop.f32.mrf.mxu1  ;;  %v2850_v36 = vld [vmem:[#allocation10 + $0x1c8] sm:$0xf]  ;;  %v2715_v31 = vor.u32 %v3069_v23, %v2714_v29 }
  0xc9   :  { %1899 = vmatpush.bf16.msrb.mxu0 %v2639_v47  ;;  %v2851_v39 = vor.u32 %v3104_v38, %v2850_v36  ;;  %v2735_v47 = vor.u32 %v3073_v43, %v2732_v32  ;;  %v2879_v36 = vor.u32 %v3109_v33, %v2876_v34  ;;  %v3075_v38 = vld [vmem:[#allocation10 + $0xe8] sm:$0xf0]  ;;  %v3066_v43 = vld [vmem:[#allocation10 + $0xa0] sm:$0xf0] }
  0xca   :  { %v3106_v32 = vld [vmem:[#allocation10 + $0x1e4] sm:$0xf] }
  0xcb   :  { %1883 = vmatpush.bf16.msrb.mxu3 %v2851_v39  ;;  %1871 = vmatpush.bf16.msra.mxu2 %v2731_v5  ;;  %v2703_v5 = vor.u32 %v3066_v43, %v2702_v42 }
  0xcc   :  { %1909 = vmatpush.bf16.msrb.mxu1 %v2783_v48  ;;  %v3483_v10 = vpop.f32.mrf.mxu2  ;;  %v2775_v48 = vor.u32 %v3084_v12, %v2774_v45  ;;  %v2864_v45 = vld [vmem:[#allocation10 + $0x1ec] sm:$0xf0]  ;;  %v2726_v12 = vld [vmem:[#allocation10 + $0xc8] sm:$0xf] }
  0xcd   :  { %v3473_v28 = vpop.f32.mrf.mxu3  ;;  %1900 = vmatpush.bf16.msrb.mxu0 %v2627_v58  ;;  %v2719_v58 = vor.u32 %v3071_v56, %v2718_v55  ;;  %v2690_v55 = vld [vmem:[#allocation10 + $0x80] sm:$0xf]  ;;  %v3063_v56 = vld [vmem:[#allocation10 + $0x88] sm:$0xf0] }
  0xce   :  { %v2691_v60 = vor.u32 %v3063_v56, %v2690_v55  ;;  %v3114_v55 = vld [vmem:[#allocation10 + $0x220] sm:$0xf0]  ;;  %v3051_v56 = vld [vmem:[#allocation10 + $0x28] sm:$0xf0] }
  0xcf   :  { %1884 = vmatpush.bf16.msrb.mxu3 %v2839_v54  ;;  %1872 = vmatpush.bf16.msra.mxu2 %v2719_v58  ;;  %v3510_v58 = vld [vmem:[%s3583_s4] sm:$0x7]  ;;  %s3358_s4 = smov [#allocation13]  }
  0xd0   :  { %1910 = vmatpush.bf16.msrb.mxu1 %v2771_v62  ;;  %v2900_v62 = vld [vmem:[#allocation10 + $0x234] sm:$0xf0]  ;;  %s2029_s13 = sshll.u32 %s3358_s4, 4  ;;  %s2030_s13 = int_to_ptr.vmem [resolvable:$true] %s2029_s13 }
  0xd1   :  { %1949 = vmatpush.bf16.msra.mxu0 %v2811_v1  ;;  %v2903_v0 = vor.u32 %v3115_v61, %v2900_v62  ;;  %v2762_v1 = vld [vmem:[#allocation10 + $0x110] sm:$0xf]  ;;  %v3103_v61 = vld [vmem:[#allocation10 + $0x1cc] sm:$0xf]  ;;  %v2852_v62 = vld [vmem:[#allocation10 + $0x1d4] sm:$0xf0] }
  0xd2   :  { %v2763_v6 = vor.u32 %v3081_v2, %v2762_v1  ;;  %v1233_v2 = vperm.slane %v3510_v58, 0 }
  0xd3   :  { %1921 = vmatpush.bf16.msrb.mxu2 %v2903_v0  ;;  %1885 = vmatpush.bf16.msrb.mxu3 %v2827_v9  ;;  %v2840_v9 = vld [vmem:[#allocation10 + $0x1bc] sm:$0xf0] }
  0xd4   :  { %1911 = vmatpush.bf16.msrb.mxu1 %v2759_v20  ;;  %v3078_v20 = vld [vmem:[#allocation10 + $0x100] sm:$0xf0]  ;;  %v2843_v11 = vor.u32 %v3100_v8, %v2840_v9  ;;  %v2882_v8 = vld [vmem:[#allocation10 + $0x200] sm:$0xf]  ;;  %v3111_v9 = vld [vmem:[#allocation10 + $0x208] sm:$0xf0] }
  0xd5   :  { %1950 = vmatpush.bf16.msra.mxu0 %v2799_v21  ;;  %v2751_v22 = vor.u32 %v3078_v20, %v2750_v15 }
  0xd7   :  { %1922 = vmatpush.bf16.msrb.mxu2 %v2891_v17  ;;  %1886 = vmatpush.bf16.msrb.mxu3 %v2815_v27  ;;  %v3057_v17 = vld [vmem:[#allocation10 + $0x58] sm:$0xf0]  ;;  %v2828_v27 = vld [vmem:[#allocation10 + $0x1a4] sm:$0xf0] }
  0xd8   :  { %1912 = vmatpush.bf16.msrb.mxu1 %v2747_v59  ;;  %v2738_v59 = vld [vmem:[#allocation10 + $0xe0] sm:$0xf]  ;;  %v2831_v33 = vor.u32 %v3097_v25, %v2828_v27 }
  0xd9   :  { %1951 = vmatpush.bf16.msra.mxu0 %v2787_v35  ;;  %v2739_v41 = vor.u32 %v3075_v38, %v2738_v59  ;;  %v3094_v38 = vld [vmem:[#allocation10 + $0x184] sm:$0xf] }
  0xdb   :  { %1935 = vmatpush.bf16.msra.mxu3 %v2715_v31  ;;  %1923 = vmatpush.bf16.msrb.mxu2 %v2879_v36  ;;  %v2906_v31 = vld [vmem:[#allocation10 + $0x230] sm:$0xf]  ;;  %v2654_v36 = vld [vmem:[#allocation10 + $0x38] sm:$0xf] }
  0xdc   :  { %1913 = vmatpush.bf16.msrb.mxu1 %v2735_v47  ;;  %v2867_v47 = vor.u32 %v3106_v32, %v2864_v45  ;;  %v3117_v32 = vld [vmem:[#allocation10 + $0x238] sm:$0xf0] }
  0xdd   :  { %v3485_v18 = vpop.f32.mrf.mxu0  ;;  %1952 = vmatpush.bf16.msra.mxu0 %v2775_v48  ;;  %v3072_v48 = vld [vmem:[#allocation10 + $0xd0] sm:$0xf0] }
  0xde   :  { %v2727_v54 = vor.u32 %v3072_v48, %v2726_v12  ;;  %v2894_v48 = vld [vmem:[#allocation10 + $0x218] sm:$0xf] }
  0xdf   :  { %1936 = vmatpush.bf16.msra.mxu3 %v2703_v5  ;;  %1924 = vmatpush.bf16.msrb.mxu2 %v2867_v47  ;;  %v2907_v47 = vor.u32 %v3117_v32, %v2906_v31  ;;  %v2895_v13 = vor.u32 %v3114_v55, %v2894_v48  ;;  %v2846_v32 = vld [vmem:[#allocation10 + $0x1b8] sm:$0xf]  ;;  %v3096_v55 = vld [vmem:[#allocation10 + $0x190] sm:$0xf0] }
  0xe0   :  { %v3487_v19 = vpop.f32.mrf.mxu1  ;;  %1914 = vmatpush.bf16.msrb.mxu1 %v2723_v63 }
  0xe1   :  { %1953 = vmatpush.bf16.msra.mxu0 %v2763_v6  ;;  %v993_v6 = vadd.f32 %v3475_v37, %v979_v57 }
  0xe3   :  { %1937 = vmatpush.bf16.msra.mxu3 %v2691_v60  ;;  %v1007_v20 = vadd.f32 %v3467_v3, %v993_v6  ;;  %v3054_v3 = vld [vmem:[#allocation10 + $0x40] sm:$0xf0] }
  0xe4   :  { %v3491_v44 = vpop.f32.mrf.mxu2 }
  0xe5   :  { %v3481_v52 = vpop.f32.mrf.mxu3  ;;  %v3493_v51 = vpop.f32.mrf.mxu0  ;;  %1954 = vmatpush.bf16.msra.mxu0 %v2751_v22  ;;  %v1049_v49 = vadd.f32 %v3491_v44, %v3487_v19  ;;  %v2855_v19 = vor.u32 %v3103_v61, %v2852_v62 }
  0xe7   :  { %v1063_v44 = vadd.f32 %v3481_v52, %v1049_v49  ;;  %1925 = vmatpush.bf16.msrb.mxu2 %v2855_v19  ;;  %1938 = vmatpush.bf16.msra.mxu3 %v2679_v7  ;;  %v2666_v52 = vld [vmem:[#allocation10 + $0x50] sm:$0xf]  ;;  %v3048_v19 = vld [vmem:[#allocation10 + $0x10] sm:$0xf0] }
  0xe8   :  { %v3495_v53 = vpop.f32.mrf.mxu1  ;;  %v2667_v24 = vor.u32 %v3057_v17, %v2666_v52  ;;  %v2883_v52 = vor.u32 %v3111_v9, %v2882_v8 }
  0xe9   :  { %1955 = vmatpush.bf16.msra.mxu0 %v2739_v41 }
  0xeb   :  { %1926 = vmatpush.bf16.msrb.mxu2 %v2843_v11  ;;  %1939 = vmatpush.bf16.msra.mxu3 %v2667_v24  ;;  %v3108_v24 = vld [vmem:[#allocation10 + $0x1f0] sm:$0xf0] }
  0xec   :  { %v3499_v21 = vpop.f32.mrf.mxu2 }
  0xed   :  { %v3489_v30 = vpop.f32.mrf.mxu3  ;;  %1956 = vmatpush.bf16.msra.mxu0 %v2727_v54  ;;  %v1051_v29 = vadd.f32 %v3499_v21, %v3495_v53  ;;  %v2655_v53 = vor.u32 %v3054_v3, %v2654_v36  ;;  %v3526_v21 = vadd.f32 %v3485_v18, %v1007_v20  ;;  %v2642_v18 = vld [vmem:[#allocation10 + $0x20] sm:$0xf]  ;;  %v2858_v36 = vld [vmem:[#allocation10 + $0x1d0] sm:$0xf]  ;;  %v3105_v3 = vld [vmem:[#allocation10 + $0x1d8] sm:$0xf0] }
  0xee   :  { %v2643_v60 = vor.u32 %v3051_v56, %v2642_v18 }
  0xef   :  { %1927 = vmatpush.bf16.msrb.mxu2 %v2831_v33  ;;  %1940 = vmatpush.bf16.msra.mxu3 %v2655_v53  ;;  %v3102_v53 = vld [vmem:[#allocation10 + $0x1c0] sm:$0xf0] }
  0xf3   :  { %1941 = vmatpush.bf16.msra.mxu3 %v2643_v60 }
  0xfd   :  { %v1076_v26 = vpop.f32.mrf.mxu0 }
  0xfe   :  { %v1077_v14 = vadd.f32 %v1076_v26, %v1063_v44  ;;  %v981_v26 = vadd.f32 %v3479_v46, %v3477_v40  ;;  %v1065_v40 = vadd.f32 %v3489_v30, %v1051_v29  ;;  %v1165_v30 = vmul.f32 %v3526_v21, %v3526_v21 }
 0x100   :  { %v1090_v35 = vpop.f32.mrf.mxu1 }
 0x101   :  { %v3523_v34 = vadd.f32 %v1090_v35, %v1077_v14  ;;  %v995_v35 = vadd.f32 %v3483_v10, %v981_v26 }
 0x103   :  { %v1166_v12 = vmul.f32 %v3523_v34, %v3523_v34  ;;  %v1009_v44 = vadd.f32 %v3473_v28, %v995_v35  ;;  %v2834_v35 = vld [vmem:[#allocation10 + $0x1a0] sm:$0xf] }
 0x104   :  { %v1104_v50 = vpop.f32.mrf.mxu2 }
 0x105   :  { %v3497_v4 = vpop.f32.mrf.mxu3  ;;  %v1078_v63 = vpop.f32.mrf.mxu0  ;;  %v1171_v16 = vadd.f32 %v1166_v12, %v1165_v30  ;;  %v3549_v28 = vadd.f32 %v3493_v51, %v1009_v44  ;;  %v3099_v12 = vld [vmem:[#allocation10 + $0x1a8] sm:$0xf0] }
 0x106   :  { %v1119_v37 = vadd.f32 %v3497_v4, %v1104_v50  ;;  %v2816_v4 = vld [vmem:[#allocation10 + $0x18c] sm:$0xf0]  ;;  %v1079_v49 = vadd.f32 %v1078_v63, %v1065_v40  ;;  %v2630_v63 = vld [vmem:[#allocation10 + $0x8] sm:$0xf] }
 0x107   :  { %v2819_v45 = vor.u32 %v3094_v38, %v2816_v4  ;;  %v2631_v11 = vor.u32 %v3048_v19, %v2630_v63  ;;  %v1168_v27 = vmul.f32 %v3549_v28, %v3549_v28  ;;  %v1235_v38 = vperm.slane %v3510_v58, 2 }
 0x108   :  { %v3513_v1 = vpop.f32.mrf.mxu1 }
 0x109   :  { %1928 = vmatpush.bf16.msrb.mxu2 %v2819_v45  ;;  %v3544_v6 = vadd.f32 %v3513_v1, %v1079_v49  ;;  %1942 = vmatpush.bf16.msra.mxu3 %v2631_v11  ;;  %v2835_v49 = vor.u32 %v3099_v12, %v2834_v35 }
 0x10b   :  { %v1169_v17 = vmul.f32 %v3544_v6, %v3544_v6 }
 0x10c   :  { %v1106_v22 = vpop.f32.mrf.mxu2 }
 0x10d   :  { %v3501_v39 = vpop.f32.mrf.mxu3 }
 0x10e   :  { %v1121_v10 = vadd.f32 %v3501_v39, %v1106_v22  ;;  %v2870_v22 = vld [vmem:[#allocation10 + $0x1e8] sm:$0xf] }
 0x115   :  { %v1321_v0 = vpop.f32.mrf.mxu3 }
 0x116   :  { %v1322_v15 = vadd.f32 %v1321_v0, %v1233_v2  ;;  %v1234_v0 = vperm.slane %v3510_v58, 1 }
 0x118   :  { %v1354_v41 = vmax.f32 %v1322_v15, 0.0 }
 0x11d   :  { %v1132_v23 = vpop.f32.mrf.mxu0  ;;  %v1323_v59 = vpop.f32.mrf.mxu3 }
 0x11e   :  { %v1133_v42 = vadd.f32 %v1132_v23, %v1119_v37  ;;  %v1324_v43 = vadd.f32 %v1323_v59, %v1233_v2  ;;  %v2871_v23 = vor.u32 %v3108_v24, %v2870_v22  ;;  %v1175_v59 = vadd.f32 %v1169_v17, %v1168_v27  ;;  %v1459_v27 = vld [vmem:[#allocation11] sm:$0x7] }
 0x120   :  { %v1146_v5 = vpop.f32.mrf.mxu1  ;;  %v1357_v46 = vmax.f32 %v1324_v43, 0.0  ;;  %v2859_v43 = vor.u32 %v3105_v3, %v2858_v36  ;;  %v1463_v3 = vperm.slane %v1459_v27, 2 }
 0x121   :  { %v1147_v54 = vadd.f32 %v1146_v5, %v1133_v42 }
 0x122   :  { %v3532_v50 = vpack.c.bf16 %v1357_v46, %v1354_v41  ;;  %v2847_v46 = vor.u32 %v3102_v53, %v2846_v32 }
 0x124   :  { %v1160_v57 = vpop.f32.mrf.mxu2  ;;  %1859 = vmatmul.bf16.vlgmr.msra.gmra.mxu1 %v3532_v50  ;;  %1901 = vmatmul.bf16.vlgmr.msrb.gmra.mxu0 %v3532_v50 }
 0x125   :  { %v3537_v61 = vadd.f32 %v1160_v57, %v1147_v54  ;;  %v1134_v62 = vpop.f32.mrf.mxu0  ;;  %v1335_v2 = vpop.f32.mrf.mxu3  ;;  %1963 = vmatpush.bf16.msra.mxu1 %v2907_v47  ;;  %v2822_v54 = vld [vmem:[#allocation10 + $0x188] sm:$0xf] }
 0x126   :  { %v1135_v39 = vadd.f32 %v1134_v62, %v1121_v10  ;;  %v1336_v1 = vadd.f32 %v1335_v2, %v1234_v0  ;;  %v2823_v18 = vor.u32 %v3096_v55, %v2822_v54 }
 0x127   :  { %v1167_v7 = vmul.f32 %v3537_v61, %v3537_v61 }
 0x128   :  { %v1148_v14 = vpop.f32.mrf.mxu1  ;;  %v1355_v31 = vmax.f32 %v1336_v1, 0.0 }
 0x129   :  { %v1172_v15 = vadd.f32 %v1171_v16, %v1167_v7  ;;  %1964 = vmatpush.bf16.msra.mxu1 %v2895_v13  ;;  %v1149_v20 = vadd.f32 %v1148_v14, %v1135_v39 }
 0x12b   :  { %1173 = vadd.xlane.f32.xlu0 %v1172_v15 }
 0x12c   :  { %v1162_v25 = vpop.f32.mrf.mxu2 }
 0x12d   :  { %v3555_v29 = vadd.f32 %v1162_v25, %v1149_v20  ;;  %v1349_v51 = vpop.f32.mrf.mxu0  ;;  %v1337_v37 = vpop.f32.mrf.mxu3  ;;  %1965 = vmatpush.bf16.msra.mxu1 %v2883_v52 }
 0x12e   :  { %v1338_v26 = vadd.f32 %v1337_v37, %v1234_v0  ;;  %v1350_v4 = vadd.f32 %v1349_v51, %v1235_v38  ;;  %v1462_v37 = vperm.slane %v1459_v27, 1 }
 0x12f   :  { %v1170_v33 = vmul.f32 %v3555_v29, %v3555_v29 }
 0x130   :  { %v1358_v41 = vmax.f32 %v1338_v26, 0.0  ;;  %v1356_v47 = vmax.f32 %v1350_v4, 0.0 }
 0x131   :  { %v1176_v42 = vadd.f32 %v1175_v59, %v1170_v33  ;;  %1966 = vmatpush.bf16.msra.mxu1 %v2871_v23  ;;  %v1461_v33 = vperm.slane %v1459_v27, 0 }
 0x132   :  { %v1361_v5 = vpack.c.bf16 %v1358_v41, %v1355_v31 }
 0x133   :  { %1177 = vadd.xlane.f32.xlu0 %v1176_v42 }
 0x134   :  { %1873 = vmatmul.bf16.vlgmr.msra.gmra.mxu2 %v1361_v5  ;;  %1915 = vmatmul.bf16.vlgmr.msrb.gmra.mxu1 %v1361_v5 }
 0x135   :  { %v1351_v45 = vpop.f32.mrf.mxu0  ;;  %1957 = vmatmul.bf16.vlgmr.msra.gmra.mxu0 %v1361_v5  ;;  %1967 = vmatpush.bf16.msra.mxu1 %v2859_v43 }
 0x136   :  { %v1352_v40 = vadd.f32 %v1351_v45, %v1235_v38 }
 0x138   :  { %v1359_v58 = vmax.f32 %v1352_v40, 0.0 }
 0x139   :  { %1968 = vmatpush.bf16.msra.mxu1 %v2847_v46 }
 0x13a   :  { %v1362_v48 = vpack.c.bf16 %v1359_v58, %v1356_v47 }
 0x13c   :  { %1887 = vmatmul.bf16.vlgmr.msrb.gmra.mxu3 %v1362_v48 }
 0x13d   :  { %1969 = vmatpush.bf16.msra.mxu1 %v2835_v49 }
 0x141   :  { %1970 = vmatpush.bf16.msra.mxu1 %v2823_v18 }
 0x144   :  { %1929 = vmatmul.bf16.vlgmr.msrb.gmra.mxu2 %v1362_v48  ;;  %1971 = vmatmul.bf16.vlgmr.msra.gmra.mxu1 %v1362_v48 }
 0x14c   :  { %1943 = vmatmul.bf16.vlgmr.msra.gmra.mxu3 %v3532_v50 }
 0x19e   :  { %v1174_v56 = vpop.xlane.xlu0 %1173 }
 0x19f   :  { %v1179_v30 = vmax.f32 %v1174_v56, 1e-12 }
 0x1a1   :  { %3134 = vrsqrt.f32 %v1179_v30  ;;  %v1860_v63 = vpop.f32.mrf.mxu1  ;;  %vm1187_vm2 = vweird.f32 %v1179_v30  ;;  %v1902_v20 = vpop.f32.mrf.mxu0 }
 0x1a2   :  { %v1903_v59 = vadd.f32 %v1902_v20, %v1462_v37  ;;  %v1861_v36 = vadd.f32 %v1860_v63, %v1461_v33 }
 0x1a6   :  { %v1178_v57 = vpop.xlane.xlu0 %1177 }
 0x1a7   :  { %v3135_v60 = vpop.eup %3134  ;;  %v1180_v10 = vmax.f32 %v1178_v57, 1e-12 }
 0x1a8   :  { %v1182_v62 = vmul.f32 %v3135_v60, %v1179_v30  ;;  %vm1188_vm1 = vweird.f32 %v3135_v60 }
 0x1a9   :  { %3136 = vrsqrt.f32 %v1180_v10  ;;  %vm1189_vm3 = vmor %vm1187_vm2, %vm1188_vm1  ;;  %v1862_v11 = vpop.f32.mrf.mxu1  ;;  %vm1197_vm5 = vweird.f32 %v1180_v10  ;;  %v1904_v51 = vpop.f32.mrf.mxu0 }
 0x1aa   :  { %v1183_v19 = vmul.f32 %v3135_v60, %v1182_v62  ;;  %v1905_v32 = vadd.f32 %v1904_v51, %v1462_v37  ;;  %v1863_v40 = vadd.f32 %v1862_v11, %v1461_v33 }
 0x1ac   :  { %v1184_v44 = vmul.f32 0.5, %v1183_v19 }
 0x1ae   :  { %v1185_v0 = vsub.f32 1.5, %v1184_v44 }
 0x1af   :  { %v3137_v2 = vpop.eup %3136 }
 0x1b0   :  { %v1186_v13 = vmul.f32 %v3135_v60, %v1185_v0  ;;  %v1192_v16 = vmul.f32 %v3137_v2, %v1180_v10  ;;  %vm1198_vm4 = vweird.f32 %v3137_v2 }
 0x1b1   :  { %vm1199_vm6 = vmor %vm1197_vm5, %vm1198_vm4 }
 0x1b2   :  { %v1190_v39 = vsel %vm1189_vm3, %v3135_v60, %v1186_v13  ;;  %v1193_v50 = vmul.f32 %v3137_v2, %v1192_v16 }
 0x1b3   :  { %v1201_v7 = vmul.f32 %v1190_v39, %v3526_v21  ;;  %v1202_v8 = vmul.f32 %v1190_v39, %v3523_v34  ;;  %v1203_v9 = vmul.f32 %v1190_v39, %v3537_v61  ;;  %v1916_v61 = vpop.f32.mrf.mxu1 }
 0x1b4   :  { %v1194_v14 = vmul.f32 0.5, %v1193_v50 }
 0x1b5   :  { %1207 = vst [vmem:[#allocation13] sm:$0xff] %v1201_v7 }
 0x1b6   :  { %1208 = vst [vmem:[#allocation13 + $0x8] sm:$0xff] %v1202_v8  ;;  %v1195_v15 = vsub.f32 1.5, %v1194_v14 }
 0x1b7   :  { %1209 = vst [vmem:[#allocation13 + $0x10] sm:$0xff] %v1203_v9  ;;  %v1874_v17 = vpop.f32.mrf.mxu2 }
 0x1b8   :  { %v1196_v52 = vmul.f32 %v3137_v2, %v1195_v15 }
 0x1ba   :  { %v1200_v1 = vsel %vm1199_vm6, %v3137_v2, %v1196_v52 }
 0x1bb   :  { %v1204_v22 = vmul.f32 %v1200_v1, %v3549_v28  ;;  %v1205_v21 = vmul.f32 %v1200_v1, %v3544_v6  ;;  %v1206_v34 = vmul.f32 %v1200_v1, %v3555_v29  ;;  %v1918_v23 = vpop.f32.mrf.mxu1  ;;  %v1917_v28 = vadd.f32 %v1916_v61, %v1903_v59  ;;  %v1958_v29 = vpop.f32.mrf.mxu0 }
 0x1bc   :  { %v1875_v6 = vadd.f32 %v1874_v17, %v1861_v36  ;;  %v1919_v46 = vadd.f32 %v1918_v23, %v1905_v32 }
 0x1bd   :  { %1210 = vst [vmem:[#allocation13 + $0x18] sm:$0xff] %v1204_v22 }
 0x1be   :  { %1211 = vst [vmem:[#allocation13 + $0x20] sm:$0xff] %v1205_v21 }
 0x1bf   :  { %1212 = vst [vmem:[#allocation13 + $0x28] sm:$0xff] %v1206_v34  ;;  %v1888_v24 = vpop.f32.mrf.mxu3  ;;  %v1876_v25 = vpop.f32.mrf.mxu2 }
 0x1c0   :  { %v1889_v42 = vadd.f32 %v1888_v24, %v1875_v6  ;;  %v1877_v47 = vadd.f32 %v1876_v25, %v1863_v40  ;;  %2037 = dma.vmem_to_hbm [thread:$0]  %s2030_s13, 768, %s2032_s1, [#allocation4], %s3359_s18, %s3359_s18, %s3360_s3  }
 0x1c2   :  { %v1977_v35 = vmul.f32 %v1889_v42, %v1889_v42 }
 0x1c3   :  { %v1972_v5 = vpop.f32.mrf.mxu1  ;;  %v1960_v30 = vpop.f32.mrf.mxu0 }
 0x1c7   :  { %v1890_v31 = vpop.f32.mrf.mxu3  ;;  %v1930_v26 = vpop.f32.mrf.mxu2 }
 0x1c8   :  { %v1931_v38 = vadd.f32 %v1930_v26, %v1917_v28  ;;  %v1891_v55 = vadd.f32 %v1890_v31, %v1877_v47 }
 0x1ca   :  { %v1978_v53 = vmul.f32 %v1931_v38, %v1931_v38  ;;  %v1980_v62 = vmul.f32 %v1891_v55, %v1891_v55 }
 0x1cb   :  { %v1974_v10 = vpop.f32.mrf.mxu1 }
 0x1cc   :  { %v1983_v49 = vadd.f32 %v1978_v53, %v1977_v35 }
 0x1cf   :  { %v1944_v41 = vpop.f32.mrf.mxu3  ;;  %v1932_v45 = vpop.f32.mrf.mxu2 }
 0x1d0   :  { %v1945_v43 = vadd.f32 %v1944_v41, %v1463_v3  ;;  %v1933_v58 = vadd.f32 %v1932_v45, %v1919_v46 }
 0x1d2   :  { %v1959_v4 = vadd.f32 %v1958_v29, %v1945_v43  ;;  %v1981_v57 = vmul.f32 %v1933_v58, %v1933_v58 }
 0x1d4   :  { %v1973_v12 = vadd.f32 %v1972_v5, %v1959_v4  ;;  %v1987_v44 = vadd.f32 %v1981_v57, %v1980_v62 }
 0x1d6   :  { %v1979_v48 = vmul.f32 %v1973_v12, %v1973_v12 }
 0x1d7   :  { %v1946_v54 = vpop.f32.mrf.mxu3 }
 0x1d8   :  { %v1947_v18 = vadd.f32 %v1946_v54, %v1463_v3  ;;  %v1984_v56 = vadd.f32 %v1983_v49, %v1979_v48 }
 0x1da   :  { %v1961_v60 = vadd.f32 %v1960_v30, %v1947_v18  ;;  %1985 = vadd.xlane.f32.xlu1 %v1984_v56 }
 0x1dc   :  { %v1975_v63 = vadd.f32 %v1974_v10, %v1961_v60 }
 0x1de   :  { %v1982_v19 = vmul.f32 %v1975_v63, %v1975_v63 }
 0x1e0   :  { %v1988_v0 = vadd.f32 %v1987_v44, %v1982_v19 }
 0x1e2   :  { %1989 = vadd.xlane.f32.xlu1 %v1988_v0 }
 0x24d   :  { %v1986_v2 = vpop.xlane.xlu1 %1985 }
 0x24e   :  { %v1991_v13 = vmax.f32 %v1986_v2, 1e-12 }
 0x250   :  { %3138 = vrsqrt.f32 %v1991_v13  ;;  %vm1999_vm8 = vweird.f32 %v1991_v13 }
 0x255   :  { %v1990_v16 = vpop.xlane.xlu1 %1989 }
 0x256   :  { %v3139_v39 = vpop.eup %3138  ;;  %v1992_v50 = vmax.f32 %v1990_v16, 1e-12 }
 0x257   :  { %v1994_v7 = vmul.f32 %v3139_v39, %v1991_v13  ;;  %vm2000_vm7 = vweird.f32 %v3139_v39 }
 0x258   :  { %3140 = vrsqrt.f32 %v1992_v50  ;;  %vm2001_vm9 = vmor %vm1999_vm8, %vm2000_vm7  ;;  %vm2009_vm11 = vweird.f32 %v1992_v50 }
 0x259   :  { %v1995_v8 = vmul.f32 %v3139_v39, %v1994_v7 }
 0x25b   :  { %v1996_v9 = vmul.f32 0.5, %v1995_v8 }
 0x25d   :  { %v1997_v11 = vsub.f32 1.5, %v1996_v9 }
 0x25e   :  { %v3141_v14 = vpop.eup %3140 }
 0x25f   :  { %v1998_v15 = vmul.f32 %v3139_v39, %v1997_v11  ;;  %v2004_v52 = vmul.f32 %v3141_v14, %v1992_v50  ;;  %vm2010_vm10 = vweird.f32 %v3141_v14 }
 0x260   :  { %vm2011_vm12 = vmor %vm2009_vm11, %vm2010_vm10 }
 0x261   :  { %v2002_v17 = vsel %vm2001_vm9, %v3139_v39, %v1998_v15  ;;  %v2005_v1 = vmul.f32 %v3141_v14, %v2004_v52 }
 0x262   :  { %v2013_v20 = vmul.f32 %v2002_v17, %v1889_v42  ;;  %v2014_v22 = vmul.f32 %v2002_v17, %v1931_v38  ;;  %v2015_v21 = vmul.f32 %v2002_v17, %v1973_v12 }
 0x263   :  { %v2006_v34 = vmul.f32 0.5, %v2005_v1 }
 0x264   :  { %2019 = vst [vmem:[#allocation14] sm:$0xff] %v2013_v20 }
 0x265   :  { %2020 = vst [vmem:[#allocation14 + $0x8] sm:$0xff] %v2014_v22  ;;  %v2007_v61 = vsub.f32 1.5, %v2006_v34 }
 0x266   :  { %2021 = vst [vmem:[#allocation14 + $0x10] sm:$0xff] %v2015_v21 }
 0x267   :  { %v2008_v24 = vmul.f32 %v3141_v14, %v2007_v61 }
 0x269   :  { %v2012_v25 = vsel %vm2011_vm12, %v3141_v14, %v2008_v24 }
 0x26a   :  { %v2016_v27 = vmul.f32 %v2012_v25, %v1891_v55  ;;  %v2017_v51 = vmul.f32 %v2012_v25, %v1933_v58  ;;  %v2018_v37 = vmul.f32 %v2012_v25, %v1975_v63 }
 0x26c   :  { %2022 = vst [vmem:[#allocation14 + $0x18] sm:$0xff] %v2016_v27 }
 0x26d   :  { %2023 = vst [vmem:[#allocation14 + $0x20] sm:$0xff] %v2017_v51 }
 0x26e   :  { %2024 = vst [vmem:[#allocation14 + $0x28] sm:$0xff] %v2018_v37 }
 0x26f   :  { %2050 = dma.vmem_to_hbm [thread:$0]  %s2043_s19, 768, %s2045_s22, [#allocation15], %s3359_s18, %s3359_s18, %s3360_s3  }
 0x270   :  { %3342 = dma.done.wait [#allocation4], 768  }
 0x271   :  { %3343 = vsyncadd [#allocation4], 4294966528 }
 0x272   :  { %3344 = dma.done.wait [#allocation15], 768  }
 0x273   :  { %3345 = vsyncadd [#allocation15], 4294966528 }
 0x274   :  { %2059 = vsyncpa [#allocation3], 1 }
 0x275   :  { %2060 = vsyncpa [#allocation6], 1 }
 0x276   :  { %2061 = vsyncpa [#allocation9], 1 }
 0x277   :  { %2062 = vsyncpa [#allocation12], 1 }
 0x278   :  { %2063 = vsyncpa [#allocation4], 1 }
 0x279   :  { %2064 = vsyncpa [#allocation15], 1 }

</bundles_post_ra>
